<compile_context>
chip_gen: v7x
topology: tpu7x:2x2x1
jax: 0.10.0
libtpu: 0.0.40
codegen_flags: <defaults>
</compile_context>

<pallas_src>
import functools
import math

import jax
import jax.numpy as jnp
import numpy as np
from jax.experimental import pallas as pl
from jax.experimental.pallas import tpu as pltpu

LN_EPS = 1e-5  # torch.nn.LayerNorm default


def _layernorm(v, g, b):
    mu = jnp.mean(v, axis=-1, keepdims=True)
    var = jnp.mean((v - mu) ** 2, axis=-1, keepdims=True)
    return (v - mu) * jax.lax.rsqrt(var + LN_EPS) * g + b


def vit_block_kernel(x_ref,
                     g1_ref, be1_ref,
                     wqkv_ref, bqkv_ref,
                     wc_ref, bc_ref,
                     g2_ref, be2_ref,
                     w1_ref, b1_ref,
                     w2_ref, b2_ref,
                     out_ref,
                     cat_ref,
                     *, seq_len, seq_len_real, num_head, head_dim):
    M, E = x_ref.shape            # M = blk_b * S_pad rows of the flattened (B*S_pad, E) input
    S = seq_len
    H = num_head
    D = head_dim
    blk_b = M // S
    G = H * blk_b

    x = x_ref[...]                # (M, E) f32

    # ---- norm1 (f32 statistics) ----
    xn = _layernorm(x, g1_ref[...], be1_ref[...])

    # ---- head-major activations (H, M, D): H static lane slices + leading-dim stack ----
    xh = jnp.stack([xn[:, h * D:(h + 1) * D] for h in range(H)],
                   axis=0).astype(jnp.bfloat16)                           # (H, M, D)

    # ---- fused head-batched QKV projection: ONE batched MXU einsum (no zero blocks).
    #      wqkv is (H, 3D, D) in torch (out, in) convention; 1/sqrt(D) is folded into
    #      its Q rows (and into bqkv's Q part) on the host. ----
    qkv = jnp.einsum('hmd,hed->hme', xh, wqkv_ref[...],
                     preferred_element_type=jnp.float32) + bqkv_ref[...]   # (H, M, 3D) f32

    # ---- split q/k/v and regroup the batch axis to (H*blk_b, S, D).
    #      S is padded to a multiple of 8, so these are re-tile-free leading-dim reshapes. ----
    q = qkv[:, :, 0 * D:1 * D].reshape(G, S, D).astype(jnp.bfloat16)
    k = qkv[:, :, 1 * D:2 * D].reshape(G, S, D).astype(jnp.bfloat16)
    v = qkv[:, :, 2 * D:3 * D].reshape(G, S, D).astype(jnp.bfloat16)

    # ---- attention, batched over every (head, batch) pair at once ----
    s = jnp.einsum('gqd,gkd->gqk', q, k, preferred_element_type=jnp.float32)   # (G, S, S)
    if seq_len_real != seq_len:   # trace-time branch: mask padded key columns only if needed
        kidx = jax.lax.broadcasted_iota(jnp.int32, (1, 1, S), 2)
        s = jnp.where(kidx < seq_len_real, s, jnp.float32(-1e30))
    s = s - jnp.max(s, axis=-1, keepdims=True)
    p = jnp.exp(s)
    p = p * pl.reciprocal(jnp.sum(p, axis=-1, keepdims=True), approx=True)
    pv = jnp.einsum('gqk,gkd->gqd', p.astype(jnp.bfloat16), v,
                    preferred_element_type=jnp.float32)                         # (G, S, D)

    # ---- scatter per-head outputs into the (M, E) concat scratch, then ONE fused
    #      out-projection matmul at full K = E MXU depth ----
    pv = pv.reshape(H, M, D)      # leading-dim regroup only
    for h in range(H):
        cat_ref[:, h * D:(h + 1) * D] = pv[h]
    mha = jnp.dot(cat_ref[...].astype(jnp.bfloat16), wc_ref[...],
                  preferred_element_type=jnp.float32) + bc_ref[...]

    # ---- residual 1 ----
    res1 = x + mha

    # ---- norm2 + MLP (Linear -> exact erf GELU (torch nn.GELU default) -> Linear) ----
    h2 = _layernorm(res1, g2_ref[...], be2_ref[...])
    hid = jnp.dot(h2.astype(jnp.bfloat16), w1_ref[...],
                  preferred_element_type=jnp.float32) + b1_ref[...]
    hid = 0.5 * hid * (1.0 + jax.lax.erf(hid * (1.0 / math.sqrt(2.0))))
    mlp = jnp.dot(hid.astype(jnp.bfloat16), w2_ref[...],
                  preferred_element_type=jnp.float32) + b2_ref[...]

    # ---- residual 2 ----
    out_ref[...] = (res1 + mlp).astype(out_ref.dtype)


def _choose_blk_b(B, S_pad, target_rows=512):
    """Largest divisor of B whose row block fits target_rows, capped at B//2 (when
    B >= 2) so the 'parallel' grid axis always has >= 2 steps (v7x megacore)."""
    divisors = [d for d in range(1, B + 1) if B % d == 0]
    if B >= 2:
        divisors = [d for d in divisors if d <= B // 2]
    fitting = [d for d in divisors if d * S_pad <= target_rows]
    return max(fitting) if fitting else 1


def _estimate_vmem_bytes(blk_b, S_pad, E, Hm, H, param_bytes, single_buffer_weights):
    """Rough upper bound on in-flight VMEM for one grid step."""
    M = blk_b * S_pad
    io_blocks = 2 * (2 * M * E * 4)                     # double-buffered input + output blocks
    scores = 2 * H * blk_b * S_pad * S_pad * 4          # attention scores + probabilities
    acts = M * E * 44 + M * Hm * 6                      # f32/bf16 temporaries (xn/xh/qkv/q/k/v/pv/cat/...)
    weights = param_bytes * (1 if single_buffer_weights else 2)
    return io_blocks + scores + acts + weights + (4 << 20)


def _vmem_limit_bytes(need_bytes):
    try:
        phys = int(pltpu.get_tpu_info().vmem_capacity_bytes)
    except Exception:
        phys = 64 << 20                                 # v7x-safe assumption
    cap = max(32 << 20, phys - (8 << 20))               # leave compiler-internal headroom
    return int(min(max(need_bytes, 32 << 20), cap))


def vit_block(x, params, *, num_head):
    B, S, E = x.shape
    H = num_head
    D = E // H
    Hm = params["w1_t"].shape[1]

    # Pad the sequence axis to a multiple of 8 sublanes (padded keys are masked in-kernel;
    # padded query rows are sliced off on the way out).
    S_pad = ((S + 7) // 8) * 8
    if S_pad != S:
        x = jnp.pad(x, ((0, 0), (0, S_pad - S), (0, 0)))

    blk_b = _choose_blk_b(B, S_pad)
    grid_b = B // blk_b
    M = blk_b * S_pad

    # Flatten (B, S_pad, E) -> (B*S_pad, E): each grid step presents a fat M dim to the MXU.
    x2 = x.reshape(B * S_pad, E)

    kernel = functools.partial(vit_block_kernel, seq_len=S_pad, seq_len_real=S,
                               num_head=H, head_dim=D)

    args = (x2,
            params["ln1_g"], params["ln1_b"],
            params["wqkv"], params["bqkv"],
            params["wc_t"], params["bc"],
            params["ln2_g"], params["ln2_b"],
            params["w1_t"], params["b1"],
            params["w2_t"], params["b2"])

    param_bytes = sum(int(np.prod(a.shape)) * a.dtype.itemsize for a in args[1:])

    def build(single_buffer_weights):
        def const_spec(arr):
            nd = arr.ndim
            imap = lambda i: (0,) * nd
            if single_buffer_weights:
                # Constant index map -> no re-DMA ever happens; single-buffer to halve
                # weight VMEM residency (matters on v7x's 64 MiB VMEM).
                return pl.BlockSpec(arr.shape, imap, pipeline_mode=pl.Buffered(1))
            return pl.BlockSpec(arr.shape, imap)

        in_specs = [pl.BlockSpec((M, E), lambda i: (i, 0))]
        in_specs += [const_spec(a) for a in args[1:]]

        need = _estimate_vmem_bytes(blk_b, S_pad, E, Hm, H, param_bytes,
                                    single_buffer_weights)

        return pl.pallas_call(
            kernel,
            out_shape=jax.ShapeDtypeStruct((B * S_pad, E), x.dtype),
            grid_spec=pltpu.PrefetchScalarGridSpec(
                num_scalar_prefetch=0,
                grid=(grid_b,),
                in_specs=in_specs,
                out_specs=pl.BlockSpec((M, E), lambda i: (i, 0)),
                scratch_shapes=[pltpu.VMEM((M, E), jnp.float32)],   # head-concat buffer
            ),
            compiler_params=pltpu.CompilerParams(
                dimension_semantics=("parallel",),
                vmem_limit_bytes=_vmem_limit_bytes(need),
            ),
        )

    try:
        out = jax.block_until_ready(build(True)(*args))
    except Exception:
        # Fallback: default double-buffered parameter blocks (identical semantics).
        out = jax.block_until_ready(build(False)(*args))

    out = out.reshape(B, S_pad, E)
    if S_pad != S:
        out = out[:, :S, :]
    return out


# ---------------- parameter construction (deterministic, synthetic) ----------------

def init_params(key, E, H, mlp_ratio=4):
    D = E // H
    Hm = mlp_ratio * E
    ks = jax.random.split(key, 12)

    def lin_w(k, out_f, in_f):   # torch Linear convention (out, in)
        return jax.random.normal(k, (out_f, in_f), jnp.float32) * 0.05

    def lin_b(k, out_f):
        return jax.random.normal(k, (out_f,), jnp.float32) * 0.02

    wq_h = jnp.stack([lin_w(jax.random.fold_in(ks[0], h), D, D) for h in range(H)])
    wk_h = jnp.stack([lin_w(jax.random.fold_in(ks[1], h), D, D) for h in range(H)])
    wv_h = jnp.stack([lin_w(jax.random.fold_in(ks[2], h), D, D) for h in range(H)])
    bq_h = jnp.stack([lin_b(jax.random.fold_in(ks[3], h), D) for h in range(H)])
    bk_h = jnp.stack([lin_b(jax.random.fold_in(ks[4], h), D) for h in range(H)])
    bv_h = jnp.stack([lin_b(jax.random.fold_in(ks[5], h), D) for h in range(H)])

    wc = lin_w(ks[6], E, E)
    bc = lin_b(ks[7], E)
    w1 = lin_w(ks[8], Hm, E)
    b1 = lin_b(ks[9], Hm)
    w2 = lin_w(ks[10], E, Hm)
    b2 = lin_b(ks[11], E)

    scale = 1.0 / math.sqrt(D)

    # Stacked per-head QKV weights (H, 3D, D) in torch (out, in) convention; the
    # attention 1/sqrt(D) scale is folded into the Q rows (and bq).  No zero blocks.
    wqkv = np.zeros((H, 3 * D, D), np.float32)
    bqkv = np.zeros((H, 1, 3 * D), np.float32)
    wqkv[:, 0 * D:1 * D, :] = np.asarray(wq_h) * scale
    wqkv[:, 1 * D:2 * D, :] = np.asarray(wk_h)
    wqkv[:, 2 * D:3 * D, :] = np.asarray(wv_h)
    bqkv[:, 0, 0 * D:1 * D] = np.asarray(bq_h) * scale
    bqkv[:, 0, 1 * D:2 * D] = np.asarray(bk_h)
    bqkv[:, 0, 2 * D:3 * D] = np.asarray(bv_h)

    params = dict(
        ln1_g=jnp.ones((1, E), jnp.float32),
        ln1_b=jnp.zeros((1, E), jnp.float32),
        ln2_g=jnp.ones((1, E), jnp.float32),
        ln2_b=jnp.zeros((1, E), jnp.float32),
        # matmul weights stored in bf16 (MXU-native); biases / LN params stay f32
        wqkv=jnp.asarray(wqkv, jnp.bfloat16),
        bqkv=jnp.asarray(bqkv, jnp.float32),
        wc_t=wc.T.astype(jnp.bfloat16),
        bc=bc.reshape(1, E).astype(jnp.float32),
        w1_t=w1.T.astype(jnp.bfloat16),
        b1=b1.reshape(1, Hm).astype(jnp.float32),
        w2_t=w2.T.astype(jnp.bfloat16),
        b2=b2.reshape(1, E).astype(jnp.float32),
    )
    raw = dict(wq_h=wq_h, wk_h=wk_h, wv_h=wv_h,
               bq_h=bq_h, bk_h=bk_h, bv_h=bv_h,
               wc=wc, bc=bc, w1=w1, b1=b1, w2=w2, b2=b2)
    return params, raw


# ---------------- pure-JAX f32 reference mirroring the PyTorch forward ----------------

def ref_forward(x, raw, params, E, H):
    D = E // H

    def ln(v, g, b):
        mu = jnp.mean(v, axis=-1, keepdims=True)
        var = jnp.mean((v - mu) ** 2, axis=-1, keepdims=True)
        return (v - mu) / jnp.sqrt(var + LN_EPS) * g[0] + b[0]

    xn = ln(x, params["ln1_g"], params["ln1_b"])
    seq = xn.reshape(x.shape[0], x.shape[1], H, D)
    heads = []
    for h in range(H):
        hs = seq[:, :, h, :]
        q = hs @ raw["wq_h"][h].T + raw["bq_h"][h]
        k = hs @ raw["wk_h"][h].T + raw["bk_h"][h]
        v = hs @ raw["wv_h"][h].T + raw["bv_h"][h]
        s = q @ jnp.swapaxes(k, 1, 2) / (D ** 0.5)
        p = jax.nn.softmax(s, axis=-1)
        heads.append(p @ v)
    mha = jnp.concatenate(heads, axis=-1) @ raw["wc"].T + raw["bc"]
    res1 = x + mha
    h2 = ln(res1, params["ln2_g"], params["ln2_b"])
    hid = h2 @ raw["w1"].T + raw["b1"]
    hid = 0.5 * hid * (1.0 + jax.lax.erf(hid / math.sqrt(2.0)))
    mlp = hid @ raw["w2"].T + raw["b2"]
    return res1 + mlp


if __name__ == "__main__":
    B, S, E, H = 2, 8, 32, 4   # batch, seq, embed_dim, num_heads (head_dim = 8)

    key = jax.random.PRNGKey(0)
    kx, kp = jax.random.split(key)
    x = jax.random.normal(kx, (B, S, E), jnp.float32)
    params, raw = init_params(kp, E, H)

    out = vit_block(x, params, num_head=H)
    out = jax.block_until_ready(out)

    ref = ref_forward(x, raw, params, E, H)
    assert out.shape == (B, S, E)
    # Kernel uses bf16 MXU inputs with f32 accumulation and an approx softmax
    # reciprocal; reference is pure f32, so allow bf16-level tolerance.
    assert jnp.allclose(out, ref, atol=2e-2, rtol=2e-2), "mismatch vs reference"

    print("KERNEL_OK")
</pallas_src>

<mosaic_0001>
module attributes {stable_mosaic.version = 11 : i64} {
  func.func @vit_block_kernel(%arg0: i32, %arg1: memref<8x32xf32, #tpu.memory_space<vmem>>, %arg2: memref<1x32xf32, #tpu.memory_space<vmem>>, %arg3: memref<1x32xf32, #tpu.memory_space<vmem>>, %arg4: memref<4x24x8xbf16, #tpu.memory_space<vmem>>, %arg5: memref<4x1x24xf32, #tpu.memory_space<vmem>>, %arg6: memref<32x32xbf16, #tpu.memory_space<vmem>>, %arg7: memref<1x32xf32, #tpu.memory_space<vmem>>, %arg8: memref<1x32xf32, #tpu.memory_space<vmem>>, %arg9: memref<1x32xf32, #tpu.memory_space<vmem>>, %arg10: memref<32x128xbf16, #tpu.memory_space<vmem>>, %arg11: memref<1x128xf32, #tpu.memory_space<vmem>>, %arg12: memref<128x32xbf16, #tpu.memory_space<vmem>>, %arg13: memref<1x32xf32, #tpu.memory_space<vmem>>, %arg14: memref<8x32xf32, #tpu.memory_space<vmem>>, %arg15: memref<8x32xf32, #tpu.memory_space<vmem>>) attributes {dimension_semantics = [#tpu.dimension_semantics<parallel>], iteration_bounds = array<i64: 2>, scalar_prefetch = 0 : i64, scratch_operands = 1 : i64, tpu.core_type = #tpu.core_type<tc>, window_params = [{transform_indices = @transform_0, window_bounds = array<i64: 8, 32>}, {pipeline_mode = #tpu.pipeline_mode<synchronous>, transform_indices = @transform_1, window_bounds = array<i64: 1, 32>}, {pipeline_mode = #tpu.pipeline_mode<synchronous>, transform_indices = @transform_2, window_bounds = array<i64: 1, 32>}, {pipeline_mode = #tpu.pipeline_mode<synchronous>, transform_indices = @transform_3, window_bounds = array<i64: 4, 24, 8>}, {pipeline_mode = #tpu.pipeline_mode<synchronous>, transform_indices = @transform_4, window_bounds = array<i64: 4, 1, 24>}, {pipeline_mode = #tpu.pipeline_mode<synchronous>, transform_indices = @transform_5, window_bounds = array<i64: 32, 32>}, {pipeline_mode = #tpu.pipeline_mode<synchronous>, transform_indices = @transform_6, window_bounds = array<i64: 1, 32>}, {pipeline_mode = #tpu.pipeline_mode<synchronous>, transform_indices = @transform_7, window_bounds = array<i64: 1, 32>}, {pipeline_mode = #tpu.pipeline_mode<synchronous>, transform_indices = @transform_8, window_bounds = array<i64: 1, 32>}, {pipeline_mode = #tpu.pipeline_mode<synchronous>, transform_indices = @transform_9, window_bounds = array<i64: 32, 128>}, {pipeline_mode = #tpu.pipeline_mode<synchronous>, transform_indices = @transform_10, window_bounds = array<i64: 1, 128>}, {pipeline_mode = #tpu.pipeline_mode<synchronous>, transform_indices = @transform_11, window_bounds = array<i64: 128, 32>}, {pipeline_mode = #tpu.pipeline_mode<synchronous>, transform_indices = @transform_12, window_bounds = array<i64: 1, 32>}, {transform_indices = @transform_13, window_bounds = array<i64: 8, 32>}]} {
    %c0 = arith.constant 0 : index
    %c0_0 = arith.constant 0 : index
    %0 = vector.load %arg1[%c0, %c0_0] : memref<8x32xf32, #tpu.memory_space<vmem>>, vector<8x32xf32>
    %c0_1 = arith.constant 0 : index
    %c0_2 = arith.constant 0 : index
    %1 = vector.load %arg2[%c0_1, %c0_2] : memref<1x32xf32, #tpu.memory_space<vmem>>, vector<1x32xf32>
    %c0_3 = arith.constant 0 : index
    %c0_4 = arith.constant 0 : index
    %2 = vector.load %arg3[%c0_3, %c0_4] : memref<1x32xf32, #tpu.memory_space<vmem>>, vector<1x32xf32>
    %cst = arith.constant dense<0.000000e+00> : vector<8xf32>
    %3 = vector.multi_reduction <add>, %0, %cst [1] : vector<8x32xf32> to vector<8xf32>
    %4 = vector.shape_cast %3 : vector<8xf32> to vector<8x1xf32>
    %cst_5 = arith.constant 3.200000e+01 : f32
    %5 = vector.broadcast %cst_5 : f32 to vector<8x1xf32>
    %6 = arith.divf %4, %5 : vector<8x1xf32>
    %7 = vector.broadcast %6 : vector<8x1xf32> to vector<8x32xf32>
    %8 = arith.subf %0, %7 : vector<8x32xf32>
    %9 = arith.mulf %8, %8 : vector<8x32xf32>
    %cst_6 = arith.constant dense<0.000000e+00> : vector<8xf32>
    %10 = vector.multi_reduction <add>, %9, %cst_6 [1] : vector<8x32xf32> to vector<8xf32>
    %11 = vector.shape_cast %10 : vector<8xf32> to vector<8x1xf32>
    %cst_7 = arith.constant 3.200000e+01 : f32
    %12 = vector.broadcast %cst_7 : f32 to vector<8x1xf32>
    %13 = arith.divf %11, %12 : vector<8x1xf32>
    %14 = vector.broadcast %6 : vector<8x1xf32> to vector<8x32xf32>
    %15 = arith.subf %0, %14 : vector<8x32xf32>
    %cst_8 = arith.constant 9.99999974E-6 : f32
    %16 = vector.broadcast %cst_8 : f32 to vector<8x1xf32>
    %17 = arith.addf %13, %16 : vector<8x1xf32>
    %18 = math.rsqrt %17 : vector<8x1xf32>
    %19 = vector.broadcast %18 : vector<8x1xf32> to vector<8x32xf32>
    %20 = arith.mulf %15, %19 : vector<8x32xf32>
    %21 = vector.broadcast %1 : vector<1x32xf32> to vector<8x32xf32>
    %22 = arith.mulf %20, %21 : vector<8x32xf32>
    %23 = vector.broadcast %2 : vector<1x32xf32> to vector<8x32xf32>
    %24 = arith.addf %22, %23 : vector<8x32xf32>
    %25 = vector.extract_strided_slice %24 {offsets = [0, 0], sizes = [8, 8], strides = [1, 1]} : vector<8x32xf32> to vector<8x8xf32>
    %26 = vector.extract_strided_slice %24 {offsets = [0, 8], sizes = [8, 8], strides = [1, 1]} : vector<8x32xf32> to vector<8x8xf32>
    %27 = vector.extract_strided_slice %24 {offsets = [0, 16], sizes = [8, 8], strides = [1, 1]} : vector<8x32xf32> to vector<8x8xf32>
    %28 = vector.extract_strided_slice %24 {offsets = [0, 24], sizes = [8, 8], strides = [1, 1]} : vector<8x32xf32> to vector<8x8xf32>
    %29 = vector.shape_cast %25 : vector<8x8xf32> to vector<1x8x8xf32>
    %30 = vector.shape_cast %26 : vector<8x8xf32> to vector<1x8x8xf32>
    %31 = vector.shape_cast %27 : vector<8x8xf32> to vector<1x8x8xf32>
    %32 = vector.shape_cast %28 : vector<8x8xf32> to vector<1x8x8xf32>
    %33 = tpu.concatenate %29, %30, %31, %32 in 0 : vector<1x8x8xf32>, vector<1x8x8xf32>, vector<1x8x8xf32>, vector<1x8x8xf32> -> vector<4x8x8xf32>
    %34 = arith.truncf %33 : vector<4x8x8xf32> to vector<4x8x8xbf16>
    %c0_9 = arith.constant 0 : index
    %c0_10 = arith.constant 0 : index
    %c0_11 = arith.constant 0 : index
    %35 = vector.load %arg4[%c0_9, %c0_10, %c0_11] : memref<4x24x8xbf16, #tpu.memory_space<vmem>>, vector<4x24x8xbf16>
    "tpu.trace_start"() <{level = 10 : i32, message = "hmd,hed->hme"}> : () -> ()
    %cst_12 = arith.constant dense<0.000000e+00> : vector<4x8x24xf32>
    %36 = tpu.matmul %34, %35, %cst_12 {dimension_numbers = #tpu.dot_dimension_numbers<[2], [2], [1], [1], [0, 0, 0, 1, 1, 1], [0], [0]>} : vector<4x8x8xbf16>, vector<4x24x8xbf16>, vector<4x8x24xf32> -> vector<4x8x24xf32>
    "tpu.trace_stop"() : () -> ()
    %c0_13 = arith.constant 0 : index
    %c0_14 = arith.constant 0 : index
    %c0_15 = arith.constant 0 : index
    %37 = vector.load %arg5[%c0_13, %c0_14, %c0_15] : memref<4x1x24xf32, #tpu.memory_space<vmem>>, vector<4x1x24xf32>
    %38 = vector.broadcast %37 : vector<4x1x24xf32> to vector<4x8x24xf32>
    %39 = arith.addf %36, %38 : vector<4x8x24xf32>
    %40 = vector.extract_strided_slice %39 {offsets = [0, 0, 0], sizes = [4, 8, 8], strides = [1, 1, 1]} : vector<4x8x24xf32> to vector<4x8x8xf32>
    %41 = arith.truncf %40 : vector<4x8x8xf32> to vector<4x8x8xbf16>
    %42 = vector.extract_strided_slice %39 {offsets = [0, 0, 8], sizes = [4, 8, 8], strides = [1, 1, 1]} : vector<4x8x24xf32> to vector<4x8x8xf32>
    %43 = arith.truncf %42 : vector<4x8x8xf32> to vector<4x8x8xbf16>
    %44 = vector.extract_strided_slice %39 {offsets = [0, 0, 16], sizes = [4, 8, 8], strides = [1, 1, 1]} : vector<4x8x24xf32> to vector<4x8x8xf32>
    %45 = arith.truncf %44 : vector<4x8x8xf32> to vector<4x8x8xbf16>
    "tpu.trace_start"() <{level = 10 : i32, message = "gqd,gkd->gqk"}> : () -> ()
    %cst_16 = arith.constant dense<0.000000e+00> : vector<4x8x8xf32>
    %46 = tpu.matmul %41, %43, %cst_16 {dimension_numbers = #tpu.dot_dimension_numbers<[2], [2], [1], [1], [0, 0, 0, 1, 1, 1], [0], [0]>} : vector<4x8x8xbf16>, vector<4x8x8xbf16>, vector<4x8x8xf32> -> vector<4x8x8xf32>
    "tpu.trace_stop"() : () -> ()
    %cst_17 = arith.constant dense<0xFF800000> : vector<4x8xf32>
    %47 = vector.multi_reduction <maximumf>, %46, %cst_17 [2] : vector<4x8x8xf32> to vector<4x8xf32>
    %48 = vector.shape_cast %47 : vector<4x8xf32> to vector<4x8x1xf32>
    %49 = vector.broadcast %48 : vector<4x8x1xf32> to vector<4x8x8xf32>
    %50 = arith.subf %46, %49 : vector<4x8x8xf32>
    %51 = math.exp %50 : vector<4x8x8xf32>
    %cst_18 = arith.constant dense<0.000000e+00> : vector<4x8xf32>
    %52 = vector.multi_reduction <add>, %51, %cst_18 [2] : vector<4x8x8xf32> to vector<4x8xf32>
    %53 = vector.shape_cast %52 : vector<4x8xf32> to vector<4x8x1xf32>
    %54 = tpu.reciprocal %53 {approx = true} : vector<4x8x1xf32> -> vector<4x8x1xf32>
    %55 = vector.broadcast %54 : vector<4x8x1xf32> to vector<4x8x8xf32>
    %56 = arith.mulf %51, %55 : vector<4x8x8xf32>
    %57 = arith.truncf %56 : vector<4x8x8xf32> to vector<4x8x8xbf16>
    "tpu.trace_start"() <{level = 10 : i32, message = "gqk,gkd->gqd"}> : () -> ()
    %cst_19 = arith.constant dense<0.000000e+00> : vector<4x8x8xf32>
    %58 = tpu.matmul %57, %45, %cst_19 {dimension_numbers = #tpu.dot_dimension_numbers<[2], [1], [1], [2], [0, 0, 0, 1, 1, 2], [0], [0]>} : vector<4x8x8xbf16>, vector<4x8x8xbf16>, vector<4x8x8xf32> -> vector<4x8x8xf32>
    "tpu.trace_stop"() : () -> ()
    %59 = vector.extract_strided_slice %58 {offsets = [0, 0, 0], sizes = [1, 8, 8], strides = [1, 1, 1]} : vector<4x8x8xf32> to vector<1x8x8xf32>
    %60 = vector.shape_cast %59 : vector<1x8x8xf32> to vector<8x8xf32>
    %c0_20 = arith.constant 0 : index
    %c0_21 = arith.constant 0 : index
    %61 = vector.load %arg15[%c0_20, %c0_21] : memref<8x32xf32, #tpu.memory_space<vmem>>, vector<8x8xf32>
    tpu.vector_store %arg15[%c0_20, %c0_21], %60 {strides = array<i32>} : memref<8x32xf32, #tpu.memory_space<vmem>>, vector<8x8xf32>,
    %62 = vector.extract_strided_slice %58 {offsets = [1, 0, 0], sizes = [1, 8, 8], strides = [1, 1, 1]} : vector<4x8x8xf32> to vector<1x8x8xf32>
    %63 = vector.shape_cast %62 : vector<1x8x8xf32> to vector<8x8xf32>
    %c0_22 = arith.constant 0 : index
    %c8 = arith.constant 8 : index
    %64 = vector.load %arg15[%c0_22, %c8] : memref<8x32xf32, #tpu.memory_space<vmem>>, vector<8x8xf32>
    tpu.vector_store %arg15[%c0_22, %c8], %63 {strides = array<i32>} : memref<8x32xf32, #tpu.memory_space<vmem>>, vector<8x8xf32>,
    %65 = vector.extract_strided_slice %58 {offsets = [2, 0, 0], sizes = [1, 8, 8], strides = [1, 1, 1]} : vector<4x8x8xf32> to vector<1x8x8xf32>
    %66 = vector.shape_cast %65 : vector<1x8x8xf32> to vector<8x8xf32>
    %c0_23 = arith.constant 0 : index
    %c16 = arith.constant 16 : index
    %67 = vector.load %arg15[%c0_23, %c16] : memref<8x32xf32, #tpu.memory_space<vmem>>, vector<8x8xf32>
    tpu.vector_store %arg15[%c0_23, %c16], %66 {strides = array<i32>} : memref<8x32xf32, #tpu.memory_space<vmem>>, vector<8x8xf32>,
    %68 = vector.extract_strided_slice %58 {offsets = [3, 0, 0], sizes = [1, 8, 8], strides = [1, 1, 1]} : vector<4x8x8xf32> to vector<1x8x8xf32>
    %69 = vector.shape_cast %68 : vector<1x8x8xf32> to vector<8x8xf32>
    %c0_24 = arith.constant 0 : index
    %c24 = arith.constant 24 : index
    %70 = vector.load %arg15[%c0_24, %c24] : memref<8x32xf32, #tpu.memory_space<vmem>>, vector<8x8xf32>
    tpu.vector_store %arg15[%c0_24, %c24], %69 {strides = array<i32>} : memref<8x32xf32, #tpu.memory_space<vmem>>, vector<8x8xf32>,
    %c0_25 = arith.constant 0 : index
    %c0_26 = arith.constant 0 : index
    %71 = vector.load %arg15[%c0_25, %c0_26] : memref<8x32xf32, #tpu.memory_space<vmem>>, vector<8x32xf32>
    %72 = arith.truncf %71 : vector<8x32xf32> to vector<8x32xbf16>
    %c0_27 = arith.constant 0 : index
    %c0_28 = arith.constant 0 : index
    %73 = vector.load %arg6[%c0_27, %c0_28] : memref<32x32xbf16, #tpu.memory_space<vmem>>, vector<32x32xbf16>
    %cst_29 = arith.constant dense<0.000000e+00> : vector<8x32xf32>
    %74 = tpu.matmul %72, %73, %cst_29 {dimension_numbers = #tpu.dot_dimension_numbers<[1], [0], [0], [1], [0, 0, 1, 1], [], []>} : vector<8x32xbf16>, vector<32x32xbf16>, vector<8x32xf32> -> vector<8x32xf32>
    %c0_30 = arith.constant 0 : index
    %c0_31 = arith.constant 0 : index
    %75 = vector.load %arg7[%c0_30, %c0_31] : memref<1x32xf32, #tpu.memory_space<vmem>>, vector<1x32xf32>
    %76 = vector.broadcast %75 : vector<1x32xf32> to vector<8x32xf32>
    %77 = arith.addf %74, %76 : vector<8x32xf32>
    %78 = arith.addf %0, %77 : vector<8x32xf32>
    %c0_32 = arith.constant 0 : index
    %c0_33 = arith.constant 0 : index
    %79 = vector.load %arg8[%c0_32, %c0_33] : memref<1x32xf32, #tpu.memory_space<vmem>>, vector<1x32xf32>
    %c0_34 = arith.constant 0 : index
    %c0_35 = arith.constant 0 : index
    %80 = vector.load %arg9[%c0_34, %c0_35] : memref<1x32xf32, #tpu.memory_space<vmem>>, vector<1x32xf32>
    %cst_36 = arith.constant dense<0.000000e+00> : vector<8xf32>
    %81 = vector.multi_reduction <add>, %78, %cst_36 [1] : vector<8x32xf32> to vector<8xf32>
    %82 = vector.shape_cast %81 : vector<8xf32> to vector<8x1xf32>
    %cst_37 = arith.constant 3.200000e+01 : f32
    %83 = vector.broadcast %cst_37 : f32 to vector<8x1xf32>
    %84 = arith.divf %82, %83 : vector<8x1xf32>
    %85 = vector.broadcast %84 : vector<8x1xf32> to vector<8x32xf32>
    %86 = arith.subf %78, %85 : vector<8x32xf32>
    %87 = arith.mulf %86, %86 : vector<8x32xf32>
    %cst_38 = arith.constant dense<0.000000e+00> : vector<8xf32>
    %88 = vector.multi_reduction <add>, %87, %cst_38 [1] : vector<8x32xf32> to vector<8xf32>
    %89 = vector.shape_cast %88 : vector<8xf32> to vector<8x1xf32>
    %cst_39 = arith.constant 3.200000e+01 : f32
    %90 = vector.broadcast %cst_39 : f32 to vector<8x1xf32>
    %91 = arith.divf %89, %90 : vector<8x1xf32>
    %92 = vector.broadcast %84 : vector<8x1xf32> to vector<8x32xf32>
    %93 = arith.subf %78, %92 : vector<8x32xf32>
    %cst_40 = arith.constant 9.99999974E-6 : f32
    %94 = vector.broadcast %cst_40 : f32 to vector<8x1xf32>
    %95 = arith.addf %91, %94 : vector<8x1xf32>
    %96 = math.rsqrt %95 : vector<8x1xf32>
    %97 = vector.broadcast %96 : vector<8x1xf32> to vector<8x32xf32>
    %98 = arith.mulf %93, %97 : vector<8x32xf32>
    %99 = vector.broadcast %79 : vector<1x32xf32> to vector<8x32xf32>
    %100 = arith.mulf %98, %99 : vector<8x32xf32>
    %101 = vector.broadcast %80 : vector<1x32xf32> to vector<8x32xf32>
    %102 = arith.addf %100, %101 : vector<8x32xf32>
    %103 = arith.truncf %102 : vector<8x32xf32> to vector<8x32xbf16>
    %c0_41 = arith.constant 0 : index
    %c0_42 = arith.constant 0 : index
    %104 = vector.load %arg10[%c0_41, %c0_42] : memref<32x128xbf16, #tpu.memory_space<vmem>>, vector<32x128xbf16>
    %cst_43 = arith.constant dense<0.000000e+00> : vector<8x128xf32>
    %105 = tpu.matmul %103, %104, %cst_43 {dimension_numbers = #tpu.dot_dimension_numbers<[1], [0], [0], [1], [0, 0, 1, 1], [], []>} : vector<8x32xbf16>, vector<32x128xbf16>, vector<8x128xf32> -> vector<8x128xf32>
    %c0_44 = arith.constant 0 : index
    %c0_45 = arith.constant 0 : index
    %106 = vector.load %arg11[%c0_44, %c0_45] : memref<1x128xf32, #tpu.memory_space<vmem>>, vector<1x128xf32>
    %107 = vector.broadcast %106 : vector<1x128xf32> to vector<8x128xf32>
    %108 = arith.addf %105, %107 : vector<8x128xf32>
    %cst_46 = arith.constant 5.000000e-01 : f32
    %109 = vector.broadcast %cst_46 : f32 to vector<8x128xf32>
    %110 = arith.mulf %109, %108 : vector<8x128xf32>
    %cst_47 = arith.constant 0.707106769 : f32
    %111 = vector.broadcast %cst_47 : f32 to vector<8x128xf32>
    %112 = arith.mulf %108, %111 : vector<8x128xf32>
    %113 = math.erf %112 : vector<8x128xf32>
    %cst_48 = arith.constant 1.000000e+00 : f32
    %114 = vector.broadcast %cst_48 : f32 to vector<8x128xf32>
    %115 = arith.addf %114, %113 : vector<8x128xf32>
    %116 = arith.mulf %110, %115 : vector<8x128xf32>
    %117 = arith.truncf %116 : vector<8x128xf32> to vector<8x128xbf16>
    %c0_49 = arith.constant 0 : index
    %c0_50 = arith.constant 0 : index
    %118 = vector.load %arg12[%c0_49, %c0_50] : memref<128x32xbf16, #tpu.memory_space<vmem>>, vector<128x32xbf16>
    %cst_51 = arith.constant dense<0.000000e+00> : vector<8x32xf32>
    %119 = tpu.matmul %117, %118, %cst_51 {dimension_numbers = #tpu.dot_dimension_numbers<[1], [0], [0], [1], [0, 0, 1, 1], [], []>} : vector<8x128xbf16>, vector<128x32xbf16>, vector<8x32xf32> -> vector<8x32xf32>
    %c0_52 = arith.constant 0 : index
    %c0_53 = arith.constant 0 : index
    %120 = vector.load %arg13[%c0_52, %c0_53] : memref<1x32xf32, #tpu.memory_space<vmem>>, vector<1x32xf32>
    %121 = vector.broadcast %120 : vector<1x32xf32> to vector<8x32xf32>
    %122 = arith.addf %119, %121 : vector<8x32xf32>
    %123 = arith.addf %78, %122 : vector<8x32xf32>
    %c0_54 = arith.constant 0 : index
    %c0_55 = arith.constant 0 : index
    %124 = vector.load %arg14[%c0_54, %c0_55] : memref<8x32xf32, #tpu.memory_space<vmem>>, vector<8x32xf32>
    tpu.vector_store %arg14[%c0_54, %c0_55], %123 {strides = array<i32>} : memref<8x32xf32, #tpu.memory_space<vmem>>, vector<8x32xf32>,
    return
  }
  func.func @transform_0(%arg0: i32) -> (i32, i32) {
    %c0_i32 = arith.constant 0 : i32
    %c0_i32_0 = arith.constant 0 : i32
    return %arg0, %c0_i32 : i32, i32
  }
  func.func @transform_1(%arg0: i32) -> (i32, i32) {
    %c0_i32 = arith.constant 0 : i32
    %c0_i32_0 = arith.constant 0 : i32
    %c0_i32_1 = arith.constant 0 : i32
    return %c0_i32, %c0_i32_0 : i32, i32
  }
  func.func @transform_2(%arg0: i32) -> (i32, i32) {
    %c0_i32 = arith.constant 0 : i32
    %c0_i32_0 = arith.constant 0 : i32
    %c0_i32_1 = arith.constant 0 : i32
    return %c0_i32, %c0_i32_0 : i32, i32
  }
  func.func @transform_3(%arg0: i32) -> (i32, i32, i32) {
    %c0_i32 = arith.constant 0 : i32
    %c0_i32_0 = arith.constant 0 : i32
    %c0_i32_1 = arith.constant 0 : i32
    %c0_i32_2 = arith.constant 0 : i32
    return %c0_i32, %c0_i32_0, %c0_i32_1 : i32, i32, i32
  }
  func.func @transform_4(%arg0: i32) -> (i32, i32, i32) {
    %c0_i32 = arith.constant 0 : i32
    %c0_i32_0 = arith.constant 0 : i32
    %c0_i32_1 = arith.constant 0 : i32
    %c0_i32_2 = arith.constant 0 : i32
    return %c0_i32, %c0_i32_0, %c0_i32_1 : i32, i32, i32
  }
  func.func @transform_5(%arg0: i32) -> (i32, i32) {
    %c0_i32 = arith.constant 0 : i32
    %c0_i32_0 = arith.constant 0 : i32
    %c0_i32_1 = arith.constant 0 : i32
    return %c0_i32, %c0_i32_0 : i32, i32
  }
  func.func @transform_6(%arg0: i32) -> (i32, i32) {
    %c0_i32 = arith.constant 0 : i32
    %c0_i32_0 = arith.constant 0 : i32
    %c0_i32_1 = arith.constant 0 : i32
    return %c0_i32, %c0_i32_0 : i32, i32
  }
  func.func @transform_7(%arg0: i32) -> (i32, i32) {
    %c0_i32 = arith.constant 0 : i32
    %c0_i32_0 = arith.constant 0 : i32
    %c0_i32_1 = arith.constant 0 : i32
    return %c0_i32, %c0_i32_0 : i32, i32
  }
  func.func @transform_8(%arg0: i32) -> (i32, i32) {
    %c0_i32 = arith.constant 0 : i32
    %c0_i32_0 = arith.constant 0 : i32
    %c0_i32_1 = arith.constant 0 : i32
    return %c0_i32, %c0_i32_0 : i32, i32
  }
  func.func @transform_9(%arg0: i32) -> (i32, i32) {
    %c0_i32 = arith.constant 0 : i32
    %c0_i32_0 = arith.constant 0 : i32
    %c0_i32_1 = arith.constant 0 : i32
    return %c0_i32, %c0_i32_0 : i32, i32
  }
  func.func @transform_10(%arg0: i32) -> (i32, i32) {
    %c0_i32 = arith.constant 0 : i32
    %c0_i32_0 = arith.constant 0 : i32
    %c0_i32_1 = arith.constant 0 : i32
    return %c0_i32, %c0_i32_0 : i32, i32
  }
  func.func @transform_11(%arg0: i32) -> (i32, i32) {
    %c0_i32 = arith.constant 0 : i32
    %c0_i32_0 = arith.constant 0 : i32
    %c0_i32_1 = arith.constant 0 : i32
    return %c0_i32, %c0_i32_0 : i32, i32
  }
  func.func @transform_12(%arg0: i32) -> (i32, i32) {
    %c0_i32 = arith.constant 0 : i32
    %c0_i32_0 = arith.constant 0 : i32
    %c0_i32_1 = arith.constant 0 : i32
    return %c0_i32, %c0_i32_0 : i32, i32
  }
  func.func @transform_13(%arg0: i32) -> (i32, i32) {
    %c0_i32 = arith.constant 0 : i32
    %c0_i32_0 = arith.constant 0 : i32
    return %arg0, %c0_i32 : i32, i32
  }
}

module attributes {stable_mosaic.version = 11 : i64} {
  func.func @vit_block_kernel(%arg0: i32, %arg1: memref<8x32xf32, #tpu.memory_space<vmem>>, %arg2: memref<1x32xf32, #tpu.memory_space<vmem>>, %arg3: memref<1x32xf32, #tpu.memory_space<vmem>>, %arg4: memref<4x24x8xbf16, #tpu.memory_space<vmem>>, %arg5: memref<4x1x24xf32, #tpu.memory_space<vmem>>, %arg6: memref<32x32xbf16, #tpu.memory_space<vmem>>, %arg7: memref<1x32xf32, #tpu.memory_space<vmem>>, %arg8: memref<1x32xf32, #tpu.memory_space<vmem>>, %arg9: memref<1x32xf32, #tpu.memory_space<vmem>>, %arg10: memref<32x128xbf16, #tpu.memory_space<vmem>>, %arg11: memref<1x128xf32, #tpu.memory_space<vmem>>, %arg12: memref<128x32xbf16, #tpu.memory_space<vmem>>, %arg13: memref<1x32xf32, #tpu.memory_space<vmem>>, %arg14: memref<8x32xf32, #tpu.memory_space<vmem>>, %arg15: memref<8x32xf32, #tpu.memory_space<vmem>>) attributes {dimension_semantics = [#tpu.dimension_semantics<parallel>], iteration_bounds = array<i64: 2>, scalar_prefetch = 0 : i64, scratch_operands = 1 : i64, tpu.core_type = #tpu.core_type<tc>, window_params = [{transform_indices = @transform_0, window_bounds = array<i64: 8, 32>}, {pipeline_mode = #tpu.pipeline_mode<synchronous>, transform_indices = @transform_1, window_bounds = array<i64: 1, 32>}, {pipeline_mode = #tpu.pipeline_mode<synchronous>, transform_indices = @transform_2, window_bounds = array<i64: 1, 32>}, {pipeline_mode = #tpu.pipeline_mode<synchronous>, transform_indices = @transform_3, window_bounds = array<i64: 4, 24, 8>}, {pipeline_mode = #tpu.pipeline_mode<synchronous>, transform_indices = @transform_4, window_bounds = array<i64: 4, 1, 24>}, {pipeline_mode = #tpu.pipeline_mode<synchronous>, transform_indices = @transform_5, window_bounds = array<i64: 32, 32>}, {pipeline_mode = #tpu.pipeline_mode<synchronous>, transform_indices = @transform_6, window_bounds = array<i64: 1, 32>}, {pipeline_mode = #tpu.pipeline_mode<synchronous>, transform_indices = @transform_7, window_bounds = array<i64: 1, 32>}, {pipeline_mode = #tpu.pipeline_mode<synchronous>, transform_indices = @transform_8, window_bounds = array<i64: 1, 32>}, {pipeline_mode = #tpu.pipeline_mode<synchronous>, transform_indices = @transform_9, window_bounds = array<i64: 32, 128>}, {pipeline_mode = #tpu.pipeline_mode<synchronous>, transform_indices = @transform_10, window_bounds = array<i64: 1, 128>}, {pipeline_mode = #tpu.pipeline_mode<synchronous>, transform_indices = @transform_11, window_bounds = array<i64: 128, 32>}, {pipeline_mode = #tpu.pipeline_mode<synchronous>, transform_indices = @transform_12, window_bounds = array<i64: 1, 32>}, {transform_indices = @transform_13, window_bounds = array<i64: 8, 32>}]} {
    %c0 = arith.constant 0 : index
    %c0_0 = arith.constant 0 : index
    %0 = vector.load %arg1[%c0, %c0_0] : memref<8x32xf32, #tpu.memory_space<vmem>>, vector<8x32xf32>
    %c0_1 = arith.constant 0 : index
    %c0_2 = arith.constant 0 : index
    %1 = vector.load %arg2[%c0_1, %c0_2] : memref<1x32xf32, #tpu.memory_space<vmem>>, vector<1x32xf32>
    %c0_3 = arith.constant 0 : index
    %c0_4 = arith.constant 0 : index
    %2 = vector.load %arg3[%c0_3, %c0_4] : memref<1x32xf32, #tpu.memory_space<vmem>>, vector<1x32xf32>
    %cst = arith.constant dense<0.000000e+00> : vector<8xf32>
    %3 = vector.multi_reduction <add>, %0, %cst [1] : vector<8x32xf32> to vector<8xf32>
    %4 = vector.shape_cast %3 : vector<8xf32> to vector<8x1xf32>
    %cst_5 = arith.constant 3.200000e+01 : f32
    %5 = vector.broadcast %cst_5 : f32 to vector<8x1xf32>
    %6 = arith.divf %4, %5 : vector<8x1xf32>
    %7 = vector.broadcast %6 : vector<8x1xf32> to vector<8x32xf32>
    %8 = arith.subf %0, %7 : vector<8x32xf32>
    %9 = arith.mulf %8, %8 : vector<8x32xf32>
    %cst_6 = arith.constant dense<0.000000e+00> : vector<8xf32>
    %10 = vector.multi_reduction <add>, %9, %cst_6 [1] : vector<8x32xf32> to vector<8xf32>
    %11 = vector.shape_cast %10 : vector<8xf32> to vector<8x1xf32>
    %cst_7 = arith.constant 3.200000e+01 : f32
    %12 = vector.broadcast %cst_7 : f32 to vector<8x1xf32>
    %13 = arith.divf %11, %12 : vector<8x1xf32>
    %14 = vector.broadcast %6 : vector<8x1xf32> to vector<8x32xf32>
    %15 = arith.subf %0, %14 : vector<8x32xf32>
    %cst_8 = arith.constant 9.99999974E-6 : f32
    %16 = vector.broadcast %cst_8 : f32 to vector<8x1xf32>
    %17 = arith.addf %13, %16 : vector<8x1xf32>
    %18 = math.rsqrt %17 : vector<8x1xf32>
    %19 = vector.broadcast %18 : vector<8x1xf32> to vector<8x32xf32>
    %20 = arith.mulf %15, %19 : vector<8x32xf32>
    %21 = vector.broadcast %1 : vector<1x32xf32> to vector<8x32xf32>
    %22 = arith.mulf %20, %21 : vector<8x32xf32>
    %23 = vector.broadcast %2 : vector<1x32xf32> to vector<8x32xf32>
    %24 = arith.addf %22, %23 : vector<8x32xf32>
    %25 = vector.extract_strided_slice %24 {offsets = [0, 0], sizes = [8, 8], strides = [1, 1]} : vector<8x32xf32> to vector<8x8xf32>
    %26 = vector.extract_strided_slice %24 {offsets = [0, 8], sizes = [8, 8], strides = [1, 1]} : vector<8x32xf32> to vector<8x8xf32>
    %27 = vector.extract_strided_slice %24 {offsets = [0, 16], sizes = [8, 8], strides = [1, 1]} : vector<8x32xf32> to vector<8x8xf32>
    %28 = vector.extract_strided_slice %24 {offsets = [0, 24], sizes = [8, 8], strides = [1, 1]} : vector<8x32xf32> to vector<8x8xf32>
    %29 = vector.shape_cast %25 : vector<8x8xf32> to vector<1x8x8xf32>
    %30 = vector.shape_cast %26 : vector<8x8xf32> to vector<1x8x8xf32>
    %31 = vector.shape_cast %27 : vector<8x8xf32> to vector<1x8x8xf32>
    %32 = vector.shape_cast %28 : vector<8x8xf32> to vector<1x8x8xf32>
    %33 = tpu.concatenate %29, %30, %31, %32 in 0 : vector<1x8x8xf32>, vector<1x8x8xf32>, vector<1x8x8xf32>, vector<1x8x8xf32> -> vector<4x8x8xf32>
    %34 = arith.truncf %33 : vector<4x8x8xf32> to vector<4x8x8xbf16>
    %c0_9 = arith.constant 0 : index
    %c0_10 = arith.constant 0 : index
    %c0_11 = arith.constant 0 : index
    %35 = vector.load %arg4[%c0_9, %c0_10, %c0_11] : memref<4x24x8xbf16, #tpu.memory_space<vmem>>, vector<4x24x8xbf16>
    "tpu.trace_start"() <{level = 10 : i32, message = "hmd,hed->hme"}> : () -> ()
    %cst_12 = arith.constant dense<0.000000e+00> : vector<4x8x24xf32>
    %36 = tpu.matmul %34, %35, %cst_12 {dimension_numbers = #tpu.dot_dimension_numbers<[2], [2], [1], [1], [0, 0, 0, 1, 1, 1], [0], [0]>} : vector<4x8x8xbf16>, vector<4x24x8xbf16>, vector<4x8x24xf32> -> vector<4x8x24xf32>
    "tpu.trace_stop"() : () -> ()
    %c0_13 = arith.constant 0 : index
    %c0_14 = arith.constant 0 : index
    %c0_15 = arith.constant 0 : index
    %37 = vector.load %arg5[%c0_13, %c0_14, %c0_15] : memref<4x1x24xf32, #tpu.memory_space<vmem>>, vector<4x1x24xf32>
    %38 = vector.broadcast %37 : vector<4x1x24xf32> to vector<4x8x24xf32>
    %39 = arith.addf %36, %38 : vector<4x8x24xf32>
    %40 = vector.extract_strided_slice %39 {offsets = [0, 0, 0], sizes = [4, 8, 8], strides = [1, 1, 1]} : vector<4x8x24xf32> to vector<4x8x8xf32>
    %41 = arith.truncf %40 : vector<4x8x8xf32> to vector<4x8x8xbf16>
    %42 = vector.extract_strided_slice %39 {offsets = [0, 0, 8], sizes = [4, 8, 8], strides = [1, 1, 1]} : vector<4x8x24xf32> to vector<4x8x8xf32>
    %43 = arith.truncf %42 : vector<4x8x8xf32> to vector<4x8x8xbf16>
    %44 = vector.extract_strided_slice %39 {offsets = [0, 0, 16], sizes = [4, 8, 8], strides = [1, 1, 1]} : vector<4x8x24xf32> to vector<4x8x8xf32>
    %45 = arith.truncf %44 : vector<4x8x8xf32> to vector<4x8x8xbf16>
    "tpu.trace_start"() <{level = 10 : i32, message = "gqd,gkd->gqk"}> : () -> ()
    %cst_16 = arith.constant dense<0.000000e+00> : vector<4x8x8xf32>
    %46 = tpu.matmul %41, %43, %cst_16 {dimension_numbers = #tpu.dot_dimension_numbers<[2], [2], [1], [1], [0, 0, 0, 1, 1, 1], [0], [0]>} : vector<4x8x8xbf16>, vector<4x8x8xbf16>, vector<4x8x8xf32> -> vector<4x8x8xf32>
    "tpu.trace_stop"() : () -> ()
    %cst_17 = arith.constant dense<0xFF800000> : vector<4x8xf32>
    %47 = vector.multi_reduction <maximumf>, %46, %cst_17 [2] : vector<4x8x8xf32> to vector<4x8xf32>
    %48 = vector.shape_cast %47 : vector<4x8xf32> to vector<4x8x1xf32>
    %49 = vector.broadcast %48 : vector<4x8x1xf32> to vector<4x8x8xf32>
    %50 = arith.subf %46, %49 : vector<4x8x8xf32>
    %51 = math.exp %50 : vector<4x8x8xf32>
    %cst_18 = arith.constant dense<0.000000e+00> : vector<4x8xf32>
    %52 = vector.multi_reduction <add>, %51, %cst_18 [2] : vector<4x8x8xf32> to vector<4x8xf32>
    %53 = vector.shape_cast %52 : vector<4x8xf32> to vector<4x8x1xf32>
    %54 = tpu.reciprocal %53 {approx = true} : vector<4x8x1xf32> -> vector<4x8x1xf32>
    %55 = vector.broadcast %54 : vector<4x8x1xf32> to vector<4x8x8xf32>
    %56 = arith.mulf %51, %55 : vector<4x8x8xf32>
    %57 = arith.truncf %56 : vector<4x8x8xf32> to vector<4x8x8xbf16>
    "tpu.trace_start"() <{level = 10 : i32, message = "gqk,gkd->gqd"}> : () -> ()
    %cst_19 = arith.constant dense<0.000000e+00> : vector<4x8x8xf32>
    %58 = tpu.matmul %57, %45, %cst_19 {dimension_numbers = #tpu.dot_dimension_numbers<[2], [1], [1], [2], [0, 0, 0, 1, 1, 2], [0], [0]>} : vector<4x8x8xbf16>, vector<4x8x8xbf16>, vector<4x8x8xf32> -> vector<4x8x8xf32>
    "tpu.trace_stop"() : () -> ()
    %59 = vector.extract_strided_slice %58 {offsets = [0, 0, 0], sizes = [1, 8, 8], strides = [1, 1, 1]} : vector<4x8x8xf32> to vector<1x8x8xf32>
    %60 = vector.shape_cast %59 : vector<1x8x8xf32> to vector<8x8xf32>
    %c0_20 = arith.constant 0 : index
    %c0_21 = arith.constant 0 : index
    %61 = vector.load %arg15[%c0_20, %c0_21] : memref<8x32xf32, #tpu.memory_space<vmem>>, vector<8x8xf32>
    tpu.vector_store %arg15[%c0_20, %c0_21], %60 {strides = array<i32>} : memref<8x32xf32, #tpu.memory_space<vmem>>, vector<8x8xf32>,
    %62 = vector.extract_strided_slice %58 {offsets = [1, 0, 0], sizes = [1, 8, 8], strides = [1, 1, 1]} : vector<4x8x8xf32> to vector<1x8x8xf32>
    %63 = vector.shape_cast %62 : vector<1x8x8xf32> to vector<8x8xf32>
    %c0_22 = arith.constant 0 : index
    %c8 = arith.constant 8 : index
    %64 = vector.load %arg15[%c0_22, %c8] : memref<8x32xf32, #tpu.memory_space<vmem>>, vector<8x8xf32>
    tpu.vector_store %arg15[%c0_22, %c8], %63 {strides = array<i32>} : memref<8x32xf32, #tpu.memory_space<vmem>>, vector<8x8xf32>,
    %65 = vector.extract_strided_slice %58 {offsets = [2, 0, 0], sizes = [1, 8, 8], strides = [1, 1, 1]} : vector<4x8x8xf32> to vector<1x8x8xf32>
    %66 = vector.shape_cast %65 : vector<1x8x8xf32> to vector<8x8xf32>
    %c0_23 = arith.constant 0 : index
    %c16 = arith.constant 16 : index
    %67 = vector.load %arg15[%c0_23, %c16] : memref<8x32xf32, #tpu.memory_space<vmem>>, vector<8x8xf32>
    tpu.vector_store %arg15[%c0_23, %c16], %66 {strides = array<i32>} : memref<8x32xf32, #tpu.memory_space<vmem>>, vector<8x8xf32>,
    %68 = vector.extract_strided_slice %58 {offsets = [3, 0, 0], sizes = [1, 8, 8], strides = [1, 1, 1]} : vector<4x8x8xf32> to vector<1x8x8xf32>
    %69 = vector.shape_cast %68 : vector<1x8x8xf32> to vector<8x8xf32>
    %c0_24 = arith.constant 0 : index
    %c24 = arith.constant 24 : index
    %70 = vector.load %arg15[%c0_24, %c24] : memref<8x32xf32, #tpu.memory_space<vmem>>, vector<8x8xf32>
    tpu.vector_store %arg15[%c0_24, %c24], %69 {strides = array<i32>} : memref<8x32xf32, #tpu.memory_space<vmem>>, vector<8x8xf32>,
    %c0_25 = arith.constant 0 : index
    %c0_26 = arith.constant 0 : index
    %71 = vector.load %arg15[%c0_25, %c0_26] : memref<8x32xf32, #tpu.memory_space<vmem>>, vector<8x32xf32>
    %72 = arith.truncf %71 : vector<8x32xf32> to vector<8x32xbf16>
    %c0_27 = arith.constant 0 : index
    %c0_28 = arith.constant 0 : index
    %73 = vector.load %arg6[%c0_27, %c0_28] : memref<32x32xbf16, #tpu.memory_space<vmem>>, vector<32x32xbf16>
    %cst_29 = arith.constant dense<0.000000e+00> : vector<8x32xf32>
    %74 = tpu.matmul %72, %73, %cst_29 {dimension_numbers = #tpu.dot_dimension_numbers<[1], [0], [0], [1], [0, 0, 1, 1], [], []>} : vector<8x32xbf16>, vector<32x32xbf16>, vector<8x32xf32> -> vector<8x32xf32>
    %c0_30 = arith.constant 0 : index
    %c0_31 = arith.constant 0 : index
    %75 = vector.load %arg7[%c0_30, %c0_31] : memref<1x32xf32, #tpu.memory_space<vmem>>, vector<1x32xf32>
    %76 = vector.broadcast %75 : vector<1x32xf32> to vector<8x32xf32>
    %77 = arith.addf %74, %76 : vector<8x32xf32>
    %78 = arith.addf %0, %77 : vector<8x32xf32>
    %c0_32 = arith.constant 0 : index
    %c0_33 = arith.constant 0 : index
    %79 = vector.load %arg8[%c0_32, %c0_33] : memref<1x32xf32, #tpu.memory_space<vmem>>, vector<1x32xf32>
    %c0_34 = arith.constant 0 : index
    %c0_35 = arith.constant 0 : index
    %80 = vector.load %arg9[%c0_34, %c0_35] : memref<1x32xf32, #tpu.memory_space<vmem>>, vector<1x32xf32>
    %cst_36 = arith.constant dense<0.000000e+00> : vector<8xf32>
    %81 = vector.multi_reduction <add>, %78, %cst_36 [1] : vector<8x32xf32> to vector<8xf32>
    %82 = vector.shape_cast %81 : vector<8xf32> to vector<8x1xf32>
    %cst_37 = arith.constant 3.200000e+01 : f32
    %83 = vector.broadcast %cst_37 : f32 to vector<8x1xf32>
    %84 = arith.divf %82, %83 : vector<8x1xf32>
    %85 = vector.broadcast %84 : vector<8x1xf32> to vector<8x32xf32>
    %86 = arith.subf %78, %85 : vector<8x32xf32>
    %87 = arith.mulf %86, %86 : vector<8x32xf32>
    %cst_38 = arith.constant dense<0.000000e+00> : vector<8xf32>
    %88 = vector.multi_reduction <add>, %87, %cst_38 [1] : vector<8x32xf32> to vector<8xf32>
    %89 = vector.shape_cast %88 : vector<8xf32> to vector<8x1xf32>
    %cst_39 = arith.constant 3.200000e+01 : f32
    %90 = vector.broadcast %cst_39 : f32 to vector<8x1xf32>
    %91 = arith.divf %89, %90 : vector<8x1xf32>
    %92 = vector.broadcast %84 : vector<8x1xf32> to vector<8x32xf32>
    %93 = arith.subf %78, %92 : vector<8x32xf32>
    %cst_40 = arith.constant 9.99999974E-6 : f32
    %94 = vector.broadcast %cst_40 : f32 to vector<8x1xf32>
    %95 = arith.addf %91, %94 : vector<8x1xf32>
    %96 = math.rsqrt %95 : vector<8x1xf32>
    %97 = vector.broadcast %96 : vector<8x1xf32> to vector<8x32xf32>
    %98 = arith.mulf %93, %97 : vector<8x32xf32>
    %99 = vector.broadcast %79 : vector<1x32xf32> to vector<8x32xf32>
    %100 = arith.mulf %98, %99 : vector<8x32xf32>
    %101 = vector.broadcast %80 : vector<1x32xf32> to vector<8x32xf32>
    %102 = arith.addf %100, %101 : vector<8x32xf32>
    %103 = arith.truncf %102 : vector<8x32xf32> to vector<8x32xbf16>
    %c0_41 = arith.constant 0 : index
    %c0_42 = arith.constant 0 : index
    %104 = vector.load %arg10[%c0_41, %c0_42] : memref<32x128xbf16, #tpu.memory_space<vmem>>, vector<32x128xbf16>
    %cst_43 = arith.constant dense<0.000000e+00> : vector<8x128xf32>
    %105 = tpu.matmul %103, %104, %cst_43 {dimension_numbers = #tpu.dot_dimension_numbers<[1], [0], [0], [1], [0, 0, 1, 1], [], []>} : vector<8x32xbf16>, vector<32x128xbf16>, vector<8x128xf32> -> vector<8x128xf32>
    %c0_44 = arith.constant 0 : index
    %c0_45 = arith.constant 0 : index
    %106 = vector.load %arg11[%c0_44, %c0_45] : memref<1x128xf32, #tpu.memory_space<vmem>>, vector<1x128xf32>
    %107 = vector.broadcast %106 : vector<1x128xf32> to vector<8x128xf32>
    %108 = arith.addf %105, %107 : vector<8x128xf32>
    %cst_46 = arith.constant 5.000000e-01 : f32
    %109 = vector.broadcast %cst_46 : f32 to vector<8x128xf32>
    %110 = arith.mulf %109, %108 : vector<8x128xf32>
    %cst_47 = arith.constant 0.707106769 : f32
    %111 = vector.broadcast %cst_47 : f32 to vector<8x128xf32>
    %112 = arith.mulf %108, %111 : vector<8x128xf32>
    %113 = math.erf %112 : vector<8x128xf32>
    %cst_48 = arith.constant 1.000000e+00 : f32
    %114 = vector.broadcast %cst_48 : f32 to vector<8x128xf32>
    %115 = arith.addf %114, %113 : vector<8x128xf32>
    %116 = arith.mulf %110, %115 : vector<8x128xf32>
    %117 = arith.truncf %116 : vector<8x128xf32> to vector<8x128xbf16>
    %c0_49 = arith.constant 0 : index
    %c0_50 = arith.constant 0 : index
    %118 = vector.load %arg12[%c0_49, %c0_50] : memref<128x32xbf16, #tpu.memory_space<vmem>>, vector<128x32xbf16>
    %cst_51 = arith.constant dense<0.000000e+00> : vector<8x32xf32>
    %119 = tpu.matmul %117, %118, %cst_51 {dimension_numbers = #tpu.dot_dimension_numbers<[1], [0], [0], [1], [0, 0, 1, 1], [], []>} : vector<8x128xbf16>, vector<128x32xbf16>, vector<8x32xf32> -> vector<8x32xf32>
    %c0_52 = arith.constant 0 : index
    %c0_53 = arith.constant 0 : index
    %120 = vector.load %arg13[%c0_52, %c0_53] : memref<1x32xf32, #tpu.memory_space<vmem>>, vector<1x32xf32>
    %121 = vector.broadcast %120 : vector<1x32xf32> to vector<8x32xf32>
    %122 = arith.addf %119, %121 : vector<8x32xf32>
    %123 = arith.addf %78, %122 : vector<8x32xf32>
    %c0_54 = arith.constant 0 : index
    %c0_55 = arith.constant 0 : index
    %124 = vector.load %arg14[%c0_54, %c0_55] : memref<8x32xf32, #tpu.memory_space<vmem>>, vector<8x32xf32>
    tpu.vector_store %arg14[%c0_54, %c0_55], %123 {strides = array<i32>} : memref<8x32xf32, #tpu.memory_space<vmem>>, vector<8x32xf32>,
    return
  }
  func.func @transform_0(%arg0: i32) -> (i32, i32) {
    %c0_i32 = arith.constant 0 : i32
    %c0_i32_0 = arith.constant 0 : i32
    return %arg0, %c0_i32 : i32, i32
  }
  func.func @transform_1(%arg0: i32) -> (i32, i32) {
    %c0_i32 = arith.constant 0 : i32
    %c0_i32_0 = arith.constant 0 : i32
    %c0_i32_1 = arith.constant 0 : i32
    return %c0_i32, %c0_i32_0 : i32, i32
  }
  func.func @transform_2(%arg0: i32) -> (i32, i32) {
    %c0_i32 = arith.constant 0 : i32
    %c0_i32_0 = arith.constant 0 : i32
    %c0_i32_1 = arith.constant 0 : i32
    return %c0_i32, %c0_i32_0 : i32, i32
  }
  func.func @transform_3(%arg0: i32) -> (i32, i32, i32) {
    %c0_i32 = arith.constant 0 : i32
    %c0_i32_0 = arith.constant 0 : i32
    %c0_i32_1 = arith.constant 0 : i32
    %c0_i32_2 = arith.constant 0 : i32
    return %c0_i32, %c0_i32_0, %c0_i32_1 : i32, i32, i32
  }
  func.func @transform_4(%arg0: i32) -> (i32, i32, i32) {
    %c0_i32 = arith.constant 0 : i32
    %c0_i32_0 = arith.constant 0 : i32
    %c0_i32_1 = arith.constant 0 : i32
    %c0_i32_2 = arith.constant 0 : i32
    return %c0_i32, %c0_i32_0, %c0_i32_1 : i32, i32, i32
  }
  func.func @transform_5(%arg0: i32) -> (i32, i32) {
    %c0_i32 = arith.constant 0 : i32
    %c0_i32_0 = arith.constant 0 : i32
    %c0_i32_1 = arith.constant 0 : i32
    return %c0_i32, %c0_i32_0 : i32, i32
  }
  func.func @transform_6(%arg0: i32) -> (i32, i32) {
    %c0_i32 = arith.constant 0 : i32
    %c0_i32_0 = arith.constant 0 : i32
    %c0_i32_1 = arith.constant 0 : i32
    return %c0_i32, %c0_i32_0 : i32, i32
  }
  func.func @transform_7(%arg0: i32) -> (i32, i32) {
    %c0_i32 = arith.constant 0 : i32
    %c0_i32_0 = arith.constant 0 : i32
    %c0_i32_1 = arith.constant 0 : i32
    return %c0_i32, %c0_i32_0 : i32, i32
  }
  func.func @transform_8(%arg0: i32) -> (i32, i32) {
    %c0_i32 = arith.constant 0 : i32
    %c0_i32_0 = arith.constant 0 : i32
    %c0_i32_1 = arith.constant 0 : i32
    return %c0_i32, %c0_i32_0 : i32, i32
  }
  func.func @transform_9(%arg0: i32) -> (i32, i32) {
    %c0_i32 = arith.constant 0 : i32
    %c0_i32_0 = arith.constant 0 : i32
    %c0_i32_1 = arith.constant 0 : i32
    return %c0_i32, %c0_i32_0 : i32, i32
  }
  func.func @transform_10(%arg0: i32) -> (i32, i32) {
    %c0_i32 = arith.constant 0 : i32
    %c0_i32_0 = arith.constant 0 : i32
    %c0_i32_1 = arith.constant 0 : i32
    return %c0_i32, %c0_i32_0 : i32, i32
  }
  func.func @transform_11(%arg0: i32) -> (i32, i32) {
    %c0_i32 = arith.constant 0 : i32
    %c0_i32_0 = arith.constant 0 : i32
    %c0_i32_1 = arith.constant 0 : i32
    return %c0_i32, %c0_i32_0 : i32, i32
  }
  func.func @transform_12(%arg0: i32) -> (i32, i32) {
    %c0_i32 = arith.constant 0 : i32
    %c0_i32_0 = arith.constant 0 : i32
    %c0_i32_1 = arith.constant 0 : i32
    return %c0_i32, %c0_i32_0 : i32, i32
  }
  func.func @transform_13(%arg0: i32) -> (i32, i32) {
    %c0_i32 = arith.constant 0 : i32
    %c0_i32_0 = arith.constant 0 : i32
    return %arg0, %c0_i32 : i32, i32
  }
}

</mosaic_0001>

<bundles_post_ra>
// kernel: tpu_custom_call.1
= control target key start
LH: loop header
LB: loop body
LE: loop exit
PB: predicated region body
PF: predicated region fallthrough
CT: control target
= control target key end

     0   :  { %s2350_s0 = inlined_call_operand.vmem [shape: f32[16,32], index: 0, kind: input, shape index: {}]   ;;  %s2351_s1 = inlined_call_operand.vmem [shape: f32[1,32], index: 1, kind: input, shape index: {}]   ;;  %s2352_s2 = inlined_call_operand.vmem [shape: f32[1,32], index: 2, kind: input, shape index: {}]   ;;  %s2353_s3 = inlined_call_operand.vmem [shape: bf16[4,24,8], index: 3, kind: input, shape index: {}]   ;;  %s2354_s4 = inlined_call_operand.vmem [shape: f32[4,1,24], index: 4, kind: input, shape index: {}]   ;;  %s2355_s5 = inlined_call_operand.vmem [shape: bf16[32,32], index: 5, kind: input, shape index: {}]   ;;  %s2356_s6 = inlined_call_operand.vmem [shape: f32[1,32], index: 6, kind: input, shape index: {}]   ;;  %s2357_s7 = inlined_call_operand.vmem [shape: f32[1,32], index: 7, kind: input, shape index: {}]   ;;  %s2358_s8 = inlined_call_operand.vmem [shape: f32[1,32], index: 8, kind: input, shape index: {}]   ;;  %s2359_s9 = inlined_call_operand.vmem [shape: bf16[32,128], index: 9, kind: input, shape index: {}]   ;;  %s2360_s10 = inlined_call_operand.vmem [shape: f32[1,128], index: 10, kind: input, shape index: {}]   ;;  %s2361_s11 = inlined_call_operand.vmem [shape: bf16[128,32], index: 11, kind: input, shape index: {}]   ;;  %s2362_s12 = inlined_call_operand.vmem [shape: f32[1,32], index: 12, kind: input, shape index: {}]   ;;  %s2363_s13 = inlined_call_operand.hbm [shape: f32[16,32], index: 13, kind: output, shape index: {}]  }
   0x1   :  { %2364 = sst [smem:[#allocation6_spill]] %s2350_s0 }
   0x2   :  { %2365 = sst [smem:[#allocation7_spill]] %s2351_s1 }
   0x3   :  { %2366 = sst [smem:[#allocation8_spill]] %s2352_s2 }
   0x4   :  { %18 = vsyncpa [#allocation4], 0 }
   0x5   :  { %20 = vsyncpa [#allocation4 + $0x1], 0  ;;  %s2015_s25 = smov 0   ;;  %s2017_s26 = smov 0  }
   0x6   :  { %s2019_s27 = smov 0   ;;  %s2021_s28 = smov 0  }
   0x7 LB: > { %s2036_s29 = sadd.s32 4294967295, %s1934_s28   ;;  %s1569_s30 = sadd.s32 4294967294, %s1934_s28   ;;  %s1934_s28 = sphi %s2021_s28, %s2375_s28   ;;  %s1930_s27 = sphi %s2019_s27, %s2374_s27   ;;  %s1926_s26 = sphi %s2017_s26, %s2373_s26   ;;  %s1922_s25 = sphi %s2015_s25, %s2372_s25  }
   0x8   : > { %s2040_s14 = sadd.s32 1, %s1934_s28   ;;  %s311_s15 = sadd.s32 1, %s1930_s27 }
   0x9   : > { %s308_s16 = ssub.s32 %s1934_s28, %s2040_s14  ;;  %p321_p0 = scmp.ne.s32.totalorder %s1930_s27, %s1926_s26 }
   0xa   : > { %p309_p1 = scmp.eq.s32.totalorder %s308_s16, 0  ;;  %p322_p2 = scmp.eq.s32.totalorder %s2036_s29, 1 }
   0xb   : > { %p327_p3 = scmp.ne.s32.totalorder %s1926_s26, %s1922_s25  ;;  %p328_p4 = scmp.eq.s32.totalorder %s1569_s30, 1 }
   0xc   : > { %s2051_s17 = scalar_select %p309_p1, %s1930_s27, %s311_s15  }
   0xd   : > { %p2053_p5 = por %p322_p2, %p321_p0  ;;  %p2057_p6 = por %p328_p4, %p327_p3 }
   0xe   : > { %p1572_p7 = scmp.ge.s32.totalorder %s1934_s28, 1  ;;  %p389_p8 = scmp.lt.s32.totalorder %s1934_s28, 3 }
  0x10   : > { %p390_p9 = pnand %p1572_p7, %p389_p8 }
  0x11   : > { %p432_p10 = scmp.lt.s32.totalorder (!%p390_p9), %s2036_s29, 1  ;;  %vm440_vm0 = vcmask (!%p390_p9), 261120   ;;  %s2369_s0 = sld [smem:[#allocation6_spill]] (!%p390_p9)  ;;  %v1830_v7 = vld [vmem:[%s2353_s3] sm:$0xff] (!%p390_p9)   ;;  %vm531_vm1 = vcmask (!%p390_p9), 64512   ;;  %v1936_v8 = vmov (!%p390_p9), 0.0  }
  0x12   : > { %393 = sbr.rel (%p390_p9) target bundleno = 2675 (0xa73), region = 72  ;;  %1667 = vmatprep.subr.bf16.mxu1 (!%p390_p9), %v1936_v8  ;;  %1683 = vmatprep.subr.bf16.mxu0 (!%p390_p9), %v1936_v8  ;;  %v536_v9 = vsel (!%p390_p9), %vm531_vm1, %v1830_v7, 0  ;;  %v1831_v10 = vld [vmem:[%s2353_s3 + $0x8] ss:$0 sps:$4 sm:$0xff] (!%p390_p9)   ;;  %vm1937_vm2 = vmmov (!%p390_p9), 0   ;;  %v1833_v12 = vld [vmem:[%s2353_s3 + $0x18] sm:$0xff] (!%p390_p9)  }
  0x13   : > { %1668 = vmatpush3.bf16.xpose.msra.mxu1 (!%p390_p9), %v536_v9  ;;  %v539_v11 = vsel (!%p390_p9), %vm531_vm1, %v1831_v10, 0  ;;  %1671 = vmatprep.mubr.msk.bf16.mxu1 (!%p390_p9), %vm1937_vm2, %v1936_v8  ;;  %v650_v13 = vsel (!%p390_p9), %vm531_vm1, %v1833_v12, 0  ;;  %v1835_v14 = vld [vmem:[%s2353_s3 + $0x20] ss:$0 sps:$4 sm:$0xff] (!%p390_p9)   ;;  %s2370_s1 = sld [smem:[#allocation7_spill]] (!%p390_p9)  ;;  %s2371_s2 = sld [smem:[#allocation8_spill]] (!%p390_p9) }
  0x14   : > { %1669 = vmatprep.subr.bf16.mxu1 (!%p390_p9), %v1936_v8  ;;  %1687 = vmatprep.mubr.msk.bf16.mxu0 (!%p390_p9), %vm1937_vm2, %v1936_v8  ;;  %v653_v15 = vsel (!%p390_p9), %vm531_vm1, %v1835_v14, 0  ;;  %v1832_v24 = vld [vmem:[%s2353_s3 + $0xc] sm:$0xff] (!%p390_p9)   ;;  %s1938_s23 = smov (!%p390_p9), 104   ;;  %s1940_s30 = smov (!%p390_p9), 112   ;;  %v1834_v28 = vld [vmem:[%s2353_s3 + $0x14] ss:$0 sps:$4 sm:$0xff] (!%p390_p9)  }
  0x15   : > { %1684 = vmatpush3.bf16.xpose.msra.mxu0 (!%p390_p9), %v650_v13  ;;  %v593_v27 = vsel (!%p390_p9), %vm531_vm1, %v1832_v24, 0  ;;  %v596_v29 = vsel (!%p390_p9), %vm531_vm1, %v1834_v28, 0  ;;  %v1836_v30 = vld [vmem:[%s2353_s3 + $0x24] sm:$0xff] (!%p390_p9)   ;;  %v1837_v36 = vld [vmem:[%s2353_s3 + $0x2c] ss:$0 sps:$4 sm:$0xff] (!%p390_p9)   ;;  %vm1005_vm3 = vcmask (!%p390_p9), 1043456  }
  0x16   : > { %1685 = vmatprep.subr.bf16.mxu0 (!%p390_p9), %v1936_v8  ;;  %v707_v33 = vsel (!%p390_p9), %vm531_vm1, %v1836_v30, 0  ;;  %v710_v37 = vsel (!%p390_p9), %vm531_vm1, %v1837_v36, 0  ;;  %v1577_v40 = vld [vmem:[%s2354_s4] ss:$0 sm:$0xff] (!%p390_p9)  ;;  %v1578_v47 = vld [vmem:[%s2354_s4 + $0x1] ss:$0 sm:$0xff] (!%p390_p9) }
  0x17   : > { %v1579_v52 = vld [vmem:[%s2354_s4 + $0x2] ss:$0 sm:$0xff] (!%p390_p9)  ;;  %v1580_v63 = vld [vmem:[%s2354_s4 + $0x3] ss:$0 sm:$0xff] (!%p390_p9)  ;;  %s1943_s15 = smov (!%p390_p9), 24   ;;  %vm1198_vm4 = vcmask (!%p390_p9), 130112  }
  0x18   : > { %vm1204_vm5 = vcmask (!%p390_p9), 195712   ;;  %vm1210_vm6 = vcmask (!%p390_p9), 261312   ;;  %s1621_s16 = sshll.u32 (!%p390_p9), %s2036_s29, 7 }
  0x19   : > { %s433_s20 = scalar_select %p432_p10, %s2036_s29, 1  ;;  %v1575_v20 = vld [vmem:[%s2370_s1] ss:$0 sm:$0xff] }
  0x1a   : > { %v1576_v22 = vld [vmem:[%s2371_s2] ss:$0 sm:$0xff]  ;;  %s2307_s1 = scalar_lea.hbm %s2363_s13, %s1621_s16 }
  0x1b   : > { %s1574_s21 = sshll.u32 %s433_s20, 3  ;;  %1670 = vmatpush3.bf16.xpose.msra.mxu1 %v539_v11 }
  0x1c   : > { %s435_s24 = scalar_lea.vmem %s2369_s0, %s1574_s21  ;;  %1675 = vmatprep.subr.bf16.mxu1 %v1936_v8  ;;  %s429_s21 = sand.u32 1, %s1926_s26  }
  0x1d   : > { %v2068_v0 = vld [vmem:[%s435_s24] sm:$0xff]  ;;  %1686 = vmatpush3.bf16.xpose.msra.mxu0 %v653_v15  ;;  %s1939_s24 = smov 120   ;;  %s1573_s22 = sshll.u32 %s429_s21, 3 }
  0x1e   : > { %v441_v1 = vsel %vm440_vm0, %v2068_v0, 0.0  ;;  %1699 = vmatprep.subr.bf16.mxu0 %v1936_v8  ;;  %s1497_s29 = scalar_lea.sflag [#allocation4], %s429_s21 }
  0x1f   : > { %442 = vadd.xlane.f32.xlu0 %v441_v1 }
  0xac   : > { %v443_v2 = vpop.xlane.xlu0 %442 }
  0xad   : > { %v445_v3 = vmul.f32 0.03125, %v443_v2 }
  0xaf   : > { %v446_v4 = vsub.f32 %v2068_v0, %v445_v3 }
  0xb1   : > { %v447_v5 = vmul.f32 %v446_v4, %v446_v4 }
  0xb3   : > { %v448_v6 = vsel %vm440_vm0, %v447_v5, 0.0 }
  0xb4   : > { %449 = vadd.xlane.f32.xlu0 %v448_v6 }
 0x141   : > { %v450_v16 = vpop.xlane.xlu0 %449 }
 0x142   : > { %v451_v17 = vmul.f32 0.03125, %v450_v16 }
 0x144   : > { %v452_v18 = vadd.f32 1e-05, %v451_v17 }
 0x146   : > { %1850 = vrsqrt.f32 %v452_v18 }
 0x150   : > { %v1851_v19 = vpop.eup %1850 }
 0x151   : > { %v454_v21 = vmul.f32 %v1851_v19, %v446_v4 }
 0x153   : > { %v461_v23 = vmul.f32 %v1575_v20, %v454_v21 }
 0x155   : > { %v468_v25 = vadd.f32 %v1576_v22, %v461_v23 }
 0x157   : > { %476 = vrot.lane.b32.xlu0 %v468_v25, %s1938_s23  ;;  %470 = vrot.lane.b32.xlu1 %v468_v25, %s1939_s24  ;;  %v479_v26 = vpack.c.bf16 %v468_v25, %v468_v25  ;;  %s1942_s23 = smov 8  }
 0x159   : > { %1672 = vmatmul.mubr.msk.bf16.vlgmr.msra.gmra.mrb[0].mxu1 %vm531_vm1, %v479_v26 }
 0x15a   : > { %1676 = vmatpush3.bf16.xpose.msra.mxu1 %v593_v27  ;;  %1679 = vmatprep.mubr.msk.bf16.mxu1 %vm1937_vm2, %v1936_v8 }
 0x15b   : > { %473 = vrot.lane.b32.xlu1 %v468_v25, %s1940_s30  ;;  %1677 = vmatprep.subr.bf16.mxu1 %v1936_v8 }
 0x162   : > { %1678 = vmatpush3.bf16.xpose.msra.mxu1 %v596_v29 }
 0x163   : > { %1691 = vmatprep.subr.bf16.mxu1 %v1936_v8 }
 0x1c9   : > { %v471_v31 = vpop.permute.xlu1 %470  ;;  %v477_v38 = vpop.permute.xlu0 %476 }
 0x1ca   : > { %v480_v32 = vpack.c.bf16 %v471_v31, %v471_v31  ;;  %v482_v39 = vpack.c.bf16 %v477_v38, %v477_v38 }
 0x1cc   : > { %1680 = vmatmul.mubr.msk.bf16.vlgmr.msra.gmra.mrb[4].mxu1 %vm531_vm1, %v480_v32 }
 0x1cd   : > { %1692 = vmatpush3.bf16.xpose.msra.mxu1 %v707_v33  ;;  %v474_v34 = vpop.permute.xlu1 %473  ;;  %1695 = vmatprep.mubr.msk.bf16.mxu1 %vm1937_vm2, %v1936_v8 }
 0x1ce   : > { %v481_v35 = vpack.c.bf16 %v474_v34, %v474_v34  ;;  %1693 = vmatprep.subr.bf16.mxu1 %v1936_v8 }
 0x1d0   : > { %1688 = vmatmul.mubr.msk.bf16.vlgmr.msra.gmra.mrb[0].mxu0 %vm531_vm1, %v481_v35 }
 0x1d1   : > { %1701 = vmatprep.mubr.msk.bf16.mxu0 %vm1937_vm2, %v1936_v8 }
 0x1d5   : > { %1694 = vmatpush3.bf16.xpose.msra.mxu1 %v710_v37 }
 0x1d6   : > { %1705 = vmatprep.subr.bf16.mxu1 %v1936_v8 }
 0x1dc   : > { %1696 = vmatmul.mubr.msk.bf16.vlgmr.msra.gmra.mrb[8].mxu1 %vm531_vm1, %v482_v39 }
 0x1dd   : > { %1707 = vmatprep.mubr.msk.bf16.mxu1 %vm1937_vm2, %v1936_v8 }
 0x22c   : > { %v575_v41 = vpop.f32.mrb[0].mxu1 }
 0x22d   : > { %v576_v42 = vadd.f32 %v1577_v40, %v575_v41  ;;  %v1673_v43 = vpop.f32.mrb[1].mxu1 }
 0x22e   : > { %v578_v44 = vpop.f32.mrb[2].mxu1 }
 0x22f   : > { %v2143_v45 = vpack.c.bf16 %v576_v42, %v576_v42  ;;  %v1674_v46 = vpop.f32.mrb[3].mxu1 }
 0x231   : > { %757 = vrot.lane.b32.xlu1 %v2143_v45, %s1939_s24 }
 0x29f   : > { %v632_v48 = vpop.f32.mrb[4].mxu1 }
 0x2a0   : > { %v633_v49 = vadd.f32 %v1578_v47, %v632_v48  ;;  %v1681_v50 = vpop.f32.mrb[5].mxu1 }
 0x2a1   : > { %v635_v51 = vpop.f32.mrb[6].mxu1 }
 0x2a2   : > { %v2153_v53 = vpack.c.bf16 %v633_v49, %v633_v49  ;;  %v1682_v54 = vpop.f32.mrb[7].mxu1 }
 0x2a3   : > { %v689_v55 = vpop.f32.mrb[0].mxu0  ;;  %v758_v56 = vpop.permute.xlu1 %757 }
 0x2a4   : > { %v690_v57 = vadd.f32 %v1579_v52, %v689_v55  ;;  %v763_v58 = vsel %vm531_vm1, %v758_v56, 0  ;;  %v1689_v59 = vpop.f32.mrb[1].mxu0  ;;  %806 = vrot.lane.b32.xlu1 %v2153_v53, %s1939_s24 }
 0x2a5   : > { %v692_v60 = vpop.f32.mrb[2].mxu0  ;;  %1700 = vmatpush3.bf16.xpose.msra.mxu0 %v763_v58 }
 0x2a6   : > { %v2158_v61 = vpack.c.bf16 %v690_v57, %v690_v57  ;;  %v1690_v62 = vpop.f32.mrb[3].mxu0  ;;  %1711 = vmatprep.subr.bf16.mxu0 %v1936_v8 }
 0x2a8   : > { %855 = vrot.lane.b32.xlu1 %v2158_v61, %s1939_s24 }
 0x2ac   : > { %1702 = vmatmul.mubr.msk.bf16.vlgmr.msra.gmra.mrb[4].mxu0 %vm531_vm1, %v2143_v45 }
 0x2ad   : > { %1713 = vmatprep.mubr.msk.bf16.mxu0 %vm1937_vm2, %v1936_v8 }
 0x2af   : > { %v746_v1 = vpop.f32.mrb[8].mxu1 }
 0x2b0   : > { %v747_v2 = vadd.f32 %v1580_v63, %v746_v1  ;;  %v1697_v3 = vpop.f32.mrb[9].mxu1 }
 0x2b1   : > { %v749_v4 = vpop.f32.mrb[10].mxu1 }
 0x2b2   : > { %v2170_v5 = vpack.c.bf16 %v747_v2, %v747_v2  ;;  %v1698_v6 = vpop.f32.mrb[11].mxu1 }
 0x2b4   : > { %904 = vrot.lane.b32.xlu1 %v2170_v5, %s1939_s24  ;;  %s1941_s24 = smov 16  }
 0x316   : > { %v807_v7 = vpop.permute.xlu1 %806 }
 0x317   : > { %v812_v9 = vsel %vm531_vm1, %v807_v7, 0 }
 0x318   : > { %1706 = vmatpush3.bf16.xpose.msra.mxu1 %v812_v9 }
 0x319   : > { %1717 = vmatprep.subr.bf16.mxu1 %v1936_v8 }
 0x31a   : > { %v856_v10 = vpop.permute.xlu1 %855 }
 0x31b   : > { %v861_v11 = vsel %vm531_vm1, %v856_v10, 0 }
 0x31c   : > { %1712 = vmatpush3.bf16.xpose.msra.mxu0 %v861_v11 }
 0x31d   : > { %1723 = vmatprep.subr.bf16.mxu0 %v1936_v8 }
 0x31f   : > { %1708 = vmatmul.mubr.msk.bf16.vlgmr.msra.gmra.mrb[12].mxu1 %vm531_vm1, %v2153_v53 }
 0x320   : > { %1719 = vmatprep.mubr.msk.bf16.mxu1 %vm1937_vm2, %v1936_v8 }
 0x323   : > { %1714 = vmatmul.mubr.msk.bf16.vlgmr.msra.gmra.mrb[8].mxu0 %vm531_vm1, %v2158_v61 }
 0x324   : > { %1725 = vmatprep.mubr.msk.bf16.mxu0 %vm1937_vm2, %v1936_v8 }
 0x326   : > { %v905_v12 = vpop.permute.xlu1 %904 }
 0x327   : > { %v910_v13 = vsel %vm531_vm1, %v905_v12, 0 }
 0x328   : > { %1718 = vmatpush3.bf16.xpose.msra.mxu1 %v910_v13 }
 0x329   : > { %1729 = vmatprep.subr.bf16.mxu1 %v1936_v8 }
 0x32f   : > { %1720 = vmatmul.mubr.msk.bf16.vlgmr.msra.gmra.mrb[16].mxu1 %vm531_vm1, %v2170_v5 }
 0x330   : > { %1731 = vmatprep.mubr.msk.bf16.mxu1 %vm1937_vm2, %v1936_v8 }
 0x37f   : > { %v799_v14 = vpop.f32.mrb[4].mxu0 }
 0x380   : > { %v1703_v15 = vpop.f32.mrb[5].mxu0  ;;  %v952_v16 = vsel %vm531_vm1, %v799_v14, -inf }
 0x381   : > { %v802_v17 = vpop.f32.mrb[6].mxu0  ;;  %953 = vmax.xlane.f32.xlu1 %v952_v16 }
 0x382   : > { %v1704_v18 = vpop.f32.mrb[7].mxu0 }
 0x3f2   : > { %v848_v19 = vpop.f32.mrb[12].mxu1 }
 0x3f3   : > { %v1709_v20 = vpop.f32.mrb[13].mxu1  ;;  %v955_v21 = vsel %vm531_vm1, %v848_v19, -inf }
 0x3f4   : > { %956 = vmax.xlane.f32.xlu0 %v955_v21  ;;  %v851_v22 = vpop.f32.mrb[14].mxu1 }
 0x3f5   : > { %v1710_v23 = vpop.f32.mrb[15].mxu1  ;;  %v1838_v22 = vld [vmem:[%s2355_s5] sm:$0xff]  }
 0x3f6   : > { %v897_v24 = vpop.f32.mrb[8].mxu0 }
 0x3f7   : > { %v1715_v25 = vpop.f32.mrb[9].mxu0  ;;  %v958_v26 = vsel %vm531_vm1, %v897_v24, -inf }
 0x3f8   : > { %v900_v27 = vpop.f32.mrb[10].mxu0  ;;  %959 = vmax.xlane.f32.xlu1 %v958_v26  ;;  %v1839_v25 = vld [vmem:[%s2355_s5 + $0x8] sm:$0xff]  }
 0x3f9   : > { %v1716_v28 = vpop.f32.mrb[11].mxu0 }
 0x402   : > { %v946_v29 = vpop.f32.mrb[16].mxu1 }
 0x403   : > { %v1721_v30 = vpop.f32.mrb[17].mxu1  ;;  %v961_v31 = vsel %vm531_vm1, %v946_v29, -inf }
 0x404   : > { %962 = vmax.xlane.f32.xlu0 %v961_v31  ;;  %v949_v32 = vpop.f32.mrb[18].mxu1 }
 0x405   : > { %v1722_v33 = vpop.f32.mrb[19].mxu1 }
 0x409   : > { %1000 = vrot.lane.b32.xlu1 %v2143_v45, %s1940_s30 }
 0x40e   : > { %v954_v34 = vpop.xlane.xlu1 %953 }
 0x40f   : > { %v964_v35 = vsub.f32 %v799_v14, %v954_v34 }
 0x411   : > { %v968_v36 = vmul.f32 1.442695, %v964_v35 }
 0x413   : > { %1852 = vpow2.f32 %v968_v36 }
 0x41d   : > { %v1853_v37 = vpop.eup %1852 }
 0x41e   : > { %v976_v38 = vsel %vm531_vm1, %v1853_v37, 0.0 }
 0x42d   : > { %977 = vadd.xlane.f32.xlu1 %v976_v38 }
 0x481   : > { %v957_v39 = vpop.xlane.xlu0 %956 }
 0x482   : > { %v965_v40 = vsub.f32 %v848_v19, %v957_v39  ;;  %v1601_v39 = vld [vmem:[%s2356_s6] ss:$0 sm:$0xff] }
 0x484   : > { %v970_v41 = vmul.f32 1.442695, %v965_v40 }
 0x485   : > { %v960_v42 = vpop.xlane.xlu1 %959 }
 0x486   : > { %1854 = vpow2.f32 %v970_v41  ;;  %v966_v43 = vsub.f32 %v897_v24, %v960_v42 }
 0x488   : > { %v972_v44 = vmul.f32 1.442695, %v966_v43 }
 0x489   : > { %v1001_v46 = vpop.permute.xlu1 %1000 }
 0x48a   : > { %1856 = vpow2.f32 %v972_v44  ;;  %v1007_v45 = vsel %vm1005_vm3, %v1001_v46, 0 }
 0x48b   : > { %1724 = vmatpush3.bf16.msra.mxu0 %v1007_v45 }
 0x48c   : > { %1735 = vmatprep.subr.bf16.mxu0 %v1936_v8 }
 0x490   : > { %v1855_v47 = vpop.eup %1854 }
 0x491   : > { %v963_v48 = vpop.xlane.xlu0 %962  ;;  %v979_v49 = vsel %vm531_vm1, %v1855_v47, 0.0 }
 0x492   : > { %v967_v50 = vsub.f32 %v946_v29, %v963_v48  ;;  %980 = vadd.xlane.f32.xlu0 %v979_v49 }
 0x494   : > { %v1857_v51 = vpop.eup %1856  ;;  %v974_v52 = vmul.f32 1.442695, %v967_v50 }
 0x495   : > { %v982_v54 = vsel %vm531_vm1, %v1857_v51, 0.0 }
 0x496   : > { %1858 = vpow2.f32 %v974_v52  ;;  %983 = vadd.xlane.f32.xlu1 %v982_v54  ;;  %v1840_v52 = vld [vmem:[%s2359_s9] sm:$0xff]  }
 0x497   : > { %v1842_v54 = vld [vmem:[%s2361_s11] sm:$0xff]  }
 0x4a0   : > { %v1859_v55 = vpop.eup %1858 }
 0x4a1   : > { %v985_v56 = vsel %vm531_vm1, %v1859_v55, 0.0 }
 0x4a2   : > { %986 = vadd.xlane.f32.xlu0 %v985_v56  ;;  %v1844_v56 = vld [vmem:[%s2361_s11 + $0x10] sm:$0xff]  }
 0x4a7   : > { %1097 = vrot.lane.b32.xlu1 %v2158_v61, %s1940_s30 }
 0x4ab   : > { %1145 = vrot.lane.b32.xlu1 %v2170_v5, %s1940_s30 }
 0x4b8   : > { %1049 = vrot.lane.b32.xlu0 %v2153_v53, %s1940_s30 }
 0x4ba   : > { %v978_v57 = vpop.xlane.xlu1 %977 }
 0x4bb   : > { %1860 = vrcp.f32 %v978_v57 }
 0x4c5   : > { %v1861_v58 = vpop.eup %1860 }
 0x4c6   : > { %v992_v59 = vmul.f32 %v1861_v58, %v1853_v37 }
 0x4c8   : > { %v996_v60 = vpack.c.bf16 %v992_v59, %v992_v59 }
 0x4ca   : > { %1726 = vmatmul.mubr.msk.bf16.vlgmr.msra.gmra.mrb[12].mxu0 %vm531_vm1, %v996_v60 }
 0x4cb   : > { %1737 = vmatprep.mubr.msk.bf16.mxu0 %vm1937_vm2, %v1936_v8 }
 0x51f   : > { %v981_v62 = vpop.xlane.xlu0 %980 }
 0x523   : > { %v984_v63 = vpop.xlane.xlu1 %983 }
 0x524   : > { %1862 = vrcp.f32 %v984_v63 }
 0x525   : > { %1864 = vrcp.f32 %v981_v62  ;;  %v1605_v62 = vld [vmem:[%s2357_s7] ss:$0 sm:$0xff] }
 0x527   : > { %v1098_v61 = vpop.permute.xlu1 %1097 }
 0x528   : > { %v1103_v1 = vsel %vm1005_vm3, %v1098_v61, 0  ;;  %v1606_v61 = vld [vmem:[%s2358_s8] ss:$0 sm:$0xff] }
 0x529   : > { %1736 = vmatpush3.bf16.msra.mxu0 %v1103_v1 }
 0x52a   : > { %1747 = vmatprep.subr.bf16.mxu0 %v1936_v8 }
 0x52b   : > { %v1146_v10 = vpop.permute.xlu1 %1145 }
 0x52c   : > { %v1151_v12 = vsel %vm1005_vm3, %v1146_v10, 0 }
 0x52e   : > { %v1863_v53 = vpop.eup %1862 }
 0x52f   : > { %v1865_v2 = vpop.eup %1864  ;;  %v994_v3 = vmul.f32 %v1863_v53, %v1857_v51  ;;  %v987_v4 = vpop.xlane.xlu0 %986 }
 0x530   : > { %1866 = vrcp.f32 %v987_v4  ;;  %v993_v6 = vmul.f32 %v1865_v2, %v1855_v47  ;;  %v1846_v4 = vld [vmem:[%s2361_s11 + $0x20] sm:$0xff]  }
 0x531   : > { %v998_v5 = vpack.c.bf16 %v994_v3, %v994_v3  ;;  %v1845_v3 = vld [vmem:[%s2361_s11 + $0x18] sm:$0xff]  }
 0x532   : > { %v997_v11 = vpack.c.bf16 %v993_v6, %v993_v6  ;;  %v1848_v6 = vld [vmem:[%s2361_s11 + $0x30] sm:$0xff]  }
 0x533   : > { %v1050_v7 = vpop.permute.xlu0 %1049  ;;  %1738 = vmatmul.mubr.msk.bf16.vlgmr.msra.gmra.mrb[16].mxu0 %vm531_vm1, %v998_v5  ;;  %v1847_v5 = vld [vmem:[%s2361_s11 + $0x28] sm:$0xff]  }
 0x534   : > { %v1055_v9 = vsel %vm1005_vm3, %v1050_v7, 0  ;;  %1751 = vmatprep.mubr.msk.bf16.mxu0 %vm1937_vm2, %v1936_v8  ;;  %1748 = vmatpush3.bf16.msra.mxu0 %v1838_v22  ;;  %v1849_v7 = vld [vmem:[%s2361_s11 + $0x38] sm:$0xff]  }
 0x535   : > { %1730 = vmatpush3.bf16.msra.mxu1 %v1055_v9  ;;  %1749 = vmatprep.subr.bf16.mxu0 %v1936_v8  ;;  %v1607_v9 = vld [vmem:[%s2360_s10] ss:$0 sm:$0xff] }
 0x536   : > { %1741 = vmatprep.subr.bf16.mxu1 %v1936_v8 }
 0x538   : > { %1732 = vmatmul.mubr.msk.bf16.vlgmr.msra.gmra.mrb[20].mxu1 %vm531_vm1, %v997_v11  ;;  %1750 = vmatpush3.bf16.msra.mxu0 %v1839_v25 }
 0x539   : > { %1742 = vmatpush3.bf16.msra.mxu1 %v1151_v12  ;;  %1743 = vmatprep.mubr.msk.bf16.mxu1 %vm1937_vm2, %v1936_v8 }
 0x53a   : > { %v1867_v13 = vpop.eup %1866  ;;  %1755 = vmatprep.subr.bf16.mxu1 %v1936_v8  ;;  %1763 = vmatprep.subr.bf16.mxu0 %v1936_v8 }
 0x53b   : > { %v995_v14 = vmul.f32 %v1867_v13, %v1859_v55  ;;  %v1843_v55 = vld [vmem:[%s2361_s11 + $0x8] sm:$0xff]  }
 0x53d   : > { %v999_v15 = vpack.c.bf16 %v995_v14, %v995_v14 }
 0x540   : > { %1744 = vmatmul.mubr.msk.bf16.vlgmr.msra.gmra.mrb[24].mxu1 %vm531_vm1, %v999_v15 }
 0x541   : > { %1759 = vmatprep.mubr.msk.bf16.mxu1 %vm1937_vm2, %v1936_v8  ;;  %1756 = vmatpush3.bf16.msra.mxu1 %v1840_v52 }
 0x542   : > { %1757 = vmatprep.subr.bf16.mxu1 %v1936_v8 }
 0x59d   : > { %v1043_v16 = vpop.f32.mrb[12].mxu0 }
 0x59e   : > { %1193 = vst.msk [vmem:[#allocation2] sm:$0xff] %vm531_vm1, %v1043_v16  ;;  %v1727_v17 = vpop.f32.mrb[13].mxu0 }
 0x59f   : > { %v1046_v18 = vpop.f32.mrb[14].mxu0 }
 0x5a0   : > { %v1728_v19 = vpop.f32.mrb[15].mxu0 }
 0x606   : > { %v1139_v20 = vpop.f32.mrb[16].mxu0 }
 0x607   : > { %1201 = vrot.lane.b32.xlu1 %v1139_v20, %s1941_s24  ;;  %v1739_v21 = vpop.f32.mrb[17].mxu0  ;;  %v1611_v20 = vld [vmem:[%s2362_s12] ss:$0 sm:$0xff]  ;;  %s431_s24 = scalar_lea.vmem [#allocation3], %s1573_s22 }
 0x608   : > { %v1142_v23 = vpop.f32.mrb[18].mxu0  ;;  %s1510_s30 = sshll.u32 %s431_s24, 4  ;;  %s2309_s30 = int_to_ptr.vmem [resolvable:$true] %s1510_s30 }
 0x609   : > { %v1740_v24 = vpop.f32.mrb[19].mxu0  ;;  %s1872_s22 = scalar_lea.vmem %s2309_s30, 128 }
 0x60a   : > { %p1873_p11 = scmp.ne.s32.totalorder %s2309_s30, %s1872_s22 }
 0x60b   : > { %v1091_v26 = vpop.f32.mrb[20].mxu1 }
 0x60c   : > { %1195 = vrot.lane.b32.xlu0 %v1091_v26, %s1942_s23  ;;  %v1733_v27 = vpop.f32.mrb[21].mxu1  ;;  %p1874_p12 = pnand %p1873_p11, %p2053_p5  ;;  %s1944_s23 = smov [#allocation3]  }
 0x60d   : > { %v1094_v28 = vpop.f32.mrb[22].mxu1 }
 0x60e   : > { %v1734_v29 = vpop.f32.mrb[23].mxu1  ;;  %p1875_p13 = pneg %p1874_p12 }
 0x613   : > { %v1187_v30 = vpop.f32.mrb[24].mxu1 }
 0x614   : > { %1207 = vrot.lane.b32.xlu0 %v1187_v30, %s1943_s15  ;;  %v1745_v31 = vpop.f32.mrb[25].mxu1  ;;  %s1876_s15 = sshll.u32 %s1944_s23, 4  ;;  %s1877_s15 = int_to_ptr.vmem [resolvable:$false] %s1876_s15 }
 0x615   : > { %v1190_v32 = vpop.f32.mrb[26].mxu1  ;;  %s1878_s2 = scalar_lea.vmem %s1877_s15, 256  ;;  %p1879_p0 = scmp.lt.s32.totalorder %s2309_s30, %s1877_s15 }
 0x616   : > { %v1746_v33 = vpop.f32.mrb[27].mxu1  ;;  %p1880_p1 = scmp.lt.s32.totalorder %s1878_s2, %s1872_s22 }
 0x618   : > { %p1881_p2 = por %p1880_p1, %p1879_p0 }
 0x61a   : > { %p1882_p3 = pnand %p1881_p2, %p1875_p13 }
 0x679   : > { %v1202_v35 = vpop.permute.xlu1 %1201 }
 0x67e   : > { %v1196_v34 = vpop.permute.xlu0 %1195 }
 0x67f   : > { %1199 = vst.msk [vmem:[#allocation2] sm:$0xff] %vm1198_vm4, %v1196_v34 }
 0x680   : > { %1205 = vst.msk [vmem:[#allocation2] sm:$0xff] %vm1204_vm5, %v1202_v35 }
 0x686   : > { %v1208_v36 = vpop.permute.xlu0 %1207 }
 0x687   : > { %1211 = vst.msk [vmem:[#allocation2] sm:$0xff] %vm1210_vm6, %v1208_v36 }
 0x68e   : > { %v1212_v37 = vld [vmem:[#allocation2] sm:$0xff] }
 0x68f   : > { %v1213_v38 = vpack.c.bf16 %v1212_v37, %v1212_v37 }
 0x691   : > { %1752 = vmatmul.mubr.msk.bf16.vlgmr.msra.gmra.mrb[20].mxu0 %vm440_vm0, %v1213_v38 }
 0x692   : > { %1779 = vmatprep.mubr.msk.bf16.mxu0 %vm1937_vm2, %v1936_v8  ;;  %1764 = vmatpush3.bf16.msra.mxu0 %v1842_v54 }
 0x693   : > { %1765 = vmatprep.subr.bf16.mxu0 %v1936_v8 }
 0x696   : > { %1766 = vmatpush3.bf16.msra.mxu0 %v1843_v55 }
 0x697   : > { %1767 = vmatprep.subr.bf16.mxu0 %v1936_v8 }
 0x69a   : > { %1768 = vmatpush3.bf16.msra.mxu0 %v1844_v56 }
 0x69b   : > { %1769 = vmatprep.subr.bf16.mxu0 %v1936_v8 }
 0x69e   : > { %1770 = vmatpush3.bf16.msra.mxu0 %v1845_v3 }
 0x69f   : > { %1771 = vmatprep.subr.bf16.mxu0 %v1936_v8 }
 0x6a2   : > { %1772 = vmatpush3.bf16.msra.mxu0 %v1846_v4 }
 0x6a3   : > { %1773 = vmatprep.subr.bf16.mxu0 %v1936_v8 }
 0x6a6   : > { %1774 = vmatpush3.bf16.msra.mxu0 %v1847_v5 }
 0x6a7   : > { %1775 = vmatprep.subr.bf16.mxu0 %v1936_v8 }
 0x6aa   : > { %1776 = vmatpush3.bf16.msra.mxu0 %v1848_v6 }
 0x6ab   : > { %1777 = vmatprep.subr.bf16.mxu0 %v1936_v8 }
 0x6ae   : > { %1778 = vmatpush3.bf16.msra.mxu0 %v1849_v7 }
 0x764   : > { %v1274_v40 = vpop.f32.mrb[20].mxu0 }
 0x765   : > { %v1275_v41 = vadd.f32 %v1601_v39, %v1274_v40  ;;  %v1753_v42 = vpop.f32.mrb[21].mxu0 }
 0x766   : > { %v1277_v43 = vpop.f32.mrb[22].mxu0 }
 0x767   : > { %v2244_v44 = vadd.f32 %v1275_v41, %v2068_v0  ;;  %v1754_v46 = vpop.f32.mrb[23].mxu0  ;;  %v1841_v0 = vld [vmem:[%s2359_s9 + $0x8] sm:$0xff]  }
 0x768   : > { %1758 = vmatpush3.bf16.msra.mxu1 %v1841_v0 }
 0x769   : > { %v1283_v45 = vsel %vm440_vm0, %v2244_v44, 0.0 }
 0x76a   : > { %1284 = vadd.xlane.f32.xlu1 %v1283_v45 }
 0x7f7   : > { %v1285_v47 = vpop.xlane.xlu1 %1284 }
 0x7f8   : > { %v1286_v48 = vmul.f32 0.03125, %v1285_v47 }
 0x7fa   : > { %v1287_v49 = vsub.f32 %v2244_v44, %v1286_v48 }
 0x7fc   : > { %v1288_v50 = vmul.f32 %v1287_v49, %v1287_v49 }
 0x7fe   : > { %v1289_v51 = vsel %vm440_vm0, %v1288_v50, 0.0 }
 0x7ff   : > { %1290 = vadd.xlane.f32.xlu0 %v1289_v51 }
 0x88c   : > { %v1291_v57 = vpop.xlane.xlu0 %1290 }
 0x88d   : > { %v1292_v58 = vmul.f32 0.03125, %v1291_v57 }
 0x88f   : > { %v1293_v59 = vadd.f32 1e-05, %v1292_v58 }
 0x891   : > { %1868 = vrsqrt.f32 %v1293_v59 }
 0x89b   : > { %v1869_v60 = vpop.eup %1868 }
 0x89c   : > { %v1295_v63 = vmul.f32 %v1869_v60, %v1287_v49 }
 0x89e   : > { %v1302_v1 = vmul.f32 %v1605_v62, %v1295_v63 }
 0x8a0   : > { %v1309_v53 = vadd.f32 %v1606_v61, %v1302_v1 }
 0x8a2   : > { %v1310_v2 = vpack.c.bf16 %v1309_v53, %v1309_v53 }
 0x8a4   : > { %1760 = vmatmul.mubr.msk.bf16.vlgmr.msra.gmra.mrb[28].mxu1 %vm440_vm0, %v1310_v2 }
 0x977   : > { %v1371_v10 = vpop.f32.mrb[28].mxu1 }
 0x978   : > { %v1372_v11 = vadd.f32 %v1607_v9, %v1371_v10  ;;  %v1761_v12 = vpop.f32.mrb[29].mxu1 }
 0x979   : > { %v1374_v13 = vpop.f32.mrb[30].mxu1 }
 0x97a   : > { %v1378_v14 = vmul.f32 0.70710677, %v1372_v11  ;;  %v1762_v15 = vpop.f32.mrb[31].mxu1  ;;  %v1377_v8 = vmul.f32 0.5, %v1372_v11 }
 0x97c   : > { %1870 = verf.f32 %v1378_v14 }
 0x986   : > { %v1871_v16 = vpop.eup %1870 }
 0x987   : > { %v1380_v17 = vadd.f32 1.0, %v1871_v16 }
 0x989   : > { %v1381_v18 = vmul.f32 %v1380_v17, %v1377_v8 }
 0x98b   : > { %v1382_v19 = vpack.c.bf16 %v1381_v18, %v1381_v18 }
 0x98d   : > { %1780 = vmatmul.mubr.bf16.vlgmr.msra.gmra.mrb[24].mxu0 %v1382_v19 }
 0xa60   : > { %v1488_v21 = vpop.f32.mrb[24].mxu0 }
 0xa61   : > { %v1489_v22 = vadd.f32 %v1611_v20, %v1488_v21  ;;  %v1781_v23 = vpop.f32.mrb[25].mxu0 }
 0xa62   : > { %v1491_v24 = vpop.f32.mrb[26].mxu0 }
 0xa63   : > { %v1494_v25 = vadd.f32 %v1489_v22, %v2244_v44  ;;  %v1782_v26 = vpop.f32.mrb[27].mxu0 }
 0xa65   : > { %1495 = vst.msk [vmem:[%s431_s24] sm:$0xff] %vm440_vm0, %v1494_v25 }
 0xa66   : > { %1885 = shalt.err (!%p1882_p3)
}
 0xa67   : > { %s1886_s0 = scalar_lea.hbm %s2307_s1, 128  ;;  %s1890_s24 = scalar_lea.hbm %s2363_s13, 256 }
 0xa68   : > { %p1887_p4 = scmp.ne.s32.totalorder %s2307_s1, %s1886_s0  ;;  %p1891_p9 = scmp.lt.u32.totalorder %s2307_s1, %s2363_s13 }
 0xa69   : > { %p1892_p10 = scmp.lt.u32.totalorder %s1890_s24, %s1886_s0  ;;  %p1894_p12 = scmp.lt.u32.totalorder %s1886_s0, %s2307_s1 }
 0xa6a   : > { %p1888_p7 = pnand %p1887_p4, %p2053_p5 }
 0xa6b   : > { %p1893_p11 = por %p1892_p10, %p1891_p9 }
 0xa6c   : > { %p1889_p8 = pneg %p1888_p7 }
 0xa6d   : > { %p1895_p13 = por %p1894_p12, %p1893_p11 }
 0xa6f   : > { %p1896_p0 = pnand %p1895_p13, %p1889_p8 }
 0xa71   : > { %1899 = shalt.err (!%p1896_p0)
}
 0xa72   : > { %1783 = dma.vmem_to_hbm [thread:$0]  (%p2053_p5), %s2309_s30, 128, %s2307_s1, %s1497_s29  }
 0xa73 PF: > { %p1789_p1 = scmp.ge.s32.totalorder %s1934_s28, 2  ;;  %s1522_s2 = sand.u32 1, %s1922_s25  }
 0xa74   : > { %s1523_s22 = scalar_lea.sflag [#allocation4], %s1522_s2 }
 0xa75   : > { %p1786_p2 = pnand %p1789_p1, %p2057_p6 }
 0xa77   : > { %1917 = dma.done.wait (!%p1786_p2), %s1523_s22, 128  }
 0xa78   : > { %1919 = vsyncadd (!%p1786_p2), %s1523_s22, 4294967168  ;;  %p23_p3 = scmp.ge.s32.totalorder %s2040_s14, 4   ;;  %s2372_s25 = smov %s1926_s26 }
 0xa79   : > { %s2373_s26 = smov %s1930_s27  ;;  %s2374_s27 = smov %s2051_s17 }
 0xa7a   : > { %s2375_s28 = smov %s2040_s14  ;;  %25 = sbr.rel (!%p23_p3) target bundleno = 7 (0x7), region = 107 }
 0xa81   :  { %1528 = vsyncpa [#allocation4], 1 }
 0xa82   :  { %1530 = vsyncpa [#allocation4 + $0x1], 1 }

// kernel: tpu_custom_call.1
= control target key start
LH: loop header
LB: loop body
LE: loop exit
PB: predicated region body
PF: predicated region fallthrough
CT: control target
= control target key end

     0   :  { %s2350_s0 = inlined_call_operand.vmem [shape: f32[16,32], index: 0, kind: input, shape index: {}]   ;;  %s2351_s1 = inlined_call_operand.vmem [shape: f32[1,32], index: 1, kind: input, shape index: {}]   ;;  %s2352_s2 = inlined_call_operand.vmem [shape: f32[1,32], index: 2, kind: input, shape index: {}]   ;;  %s2353_s3 = inlined_call_operand.vmem [shape: bf16[4,24,8], index: 3, kind: input, shape index: {}]   ;;  %s2354_s4 = inlined_call_operand.vmem [shape: f32[4,1,24], index: 4, kind: input, shape index: {}]   ;;  %s2355_s5 = inlined_call_operand.vmem [shape: bf16[32,32], index: 5, kind: input, shape index: {}]   ;;  %s2356_s6 = inlined_call_operand.vmem [shape: f32[1,32], index: 6, kind: input, shape index: {}]   ;;  %s2357_s7 = inlined_call_operand.vmem [shape: f32[1,32], index: 7, kind: input, shape index: {}]   ;;  %s2358_s8 = inlined_call_operand.vmem [shape: f32[1,32], index: 8, kind: input, shape index: {}]   ;;  %s2359_s9 = inlined_call_operand.vmem [shape: bf16[32,128], index: 9, kind: input, shape index: {}]   ;;  %s2360_s10 = inlined_call_operand.vmem [shape: f32[1,128], index: 10, kind: input, shape index: {}]   ;;  %s2361_s11 = inlined_call_operand.vmem [shape: bf16[128,32], index: 11, kind: input, shape index: {}]   ;;  %s2362_s12 = inlined_call_operand.vmem [shape: f32[1,32], index: 12, kind: input, shape index: {}]   ;;  %s2363_s13 = inlined_call_operand.hbm [shape: f32[16,32], index: 13, kind: output, shape index: {}]  }
   0x1   :  { %2364 = sst [smem:[#allocation6_spill]] %s2350_s0 }
   0x2   :  { %2365 = sst [smem:[#allocation7_spill]] %s2351_s1 }
   0x3   :  { %2366 = sst [smem:[#allocation8_spill]] %s2352_s2 }
   0x4   :  { %18 = vsyncpa [#allocation4], 0 }
   0x5   :  { %20 = vsyncpa [#allocation4 + $0x1], 0  ;;  %s2015_s25 = smov 0   ;;  %s2017_s26 = smov 0  }
   0x6   :  { %s2019_s27 = smov 0   ;;  %s2021_s28 = smov 0  }
   0x7 LB: > { %s2036_s29 = sadd.s32 4294967295, %s1934_s28   ;;  %s1569_s30 = sadd.s32 4294967294, %s1934_s28   ;;  %s1934_s28 = sphi %s2021_s28, %s2375_s28   ;;  %s1930_s27 = sphi %s2019_s27, %s2374_s27   ;;  %s1926_s26 = sphi %s2017_s26, %s2373_s26   ;;  %s1922_s25 = sphi %s2015_s25, %s2372_s25  }
   0x8   : > { %s2040_s14 = sadd.s32 1, %s1934_s28   ;;  %s311_s15 = sadd.s32 1, %s1930_s27 }
   0x9   : > { %s308_s16 = ssub.s32 %s1934_s28, %s2040_s14  ;;  %p321_p0 = scmp.ne.s32.totalorder %s1930_s27, %s1926_s26 }
   0xa   : > { %p309_p1 = scmp.eq.s32.totalorder %s308_s16, 0  ;;  %p322_p2 = scmp.eq.s32.totalorder %s2036_s29, 1 }
   0xb   : > { %p327_p3 = scmp.ne.s32.totalorder %s1926_s26, %s1922_s25  ;;  %p328_p4 = scmp.eq.s32.totalorder %s1569_s30, 1 }
   0xc   : > { %s2051_s17 = scalar_select %p309_p1, %s1930_s27, %s311_s15  }
   0xd   : > { %p2053_p5 = por %p322_p2, %p321_p0  ;;  %p2057_p6 = por %p328_p4, %p327_p3 }
   0xe   : > { %p1572_p7 = scmp.ge.s32.totalorder %s1934_s28, 1  ;;  %p389_p8 = scmp.lt.s32.totalorder %s1934_s28, 3 }
  0x10   : > { %p390_p9 = pnand %p1572_p7, %p389_p8 }
  0x11   : > { %p432_p10 = scmp.lt.s32.totalorder (!%p390_p9), %s2036_s29, 1  ;;  %vm440_vm0 = vcmask (!%p390_p9), 261120   ;;  %s2369_s0 = sld [smem:[#allocation6_spill]] (!%p390_p9)  ;;  %v1830_v7 = vld [vmem:[%s2353_s3] sm:$0xff] (!%p390_p9)   ;;  %vm531_vm1 = vcmask (!%p390_p9), 64512   ;;  %v1936_v8 = vmov (!%p390_p9), 0.0  }
  0x12   : > { %393 = sbr.rel (%p390_p9) target bundleno = 2675 (0xa73), region = 72  ;;  %1667 = vmatprep.subr.bf16.mxu1 (!%p390_p9), %v1936_v8  ;;  %1683 = vmatprep.subr.bf16.mxu0 (!%p390_p9), %v1936_v8  ;;  %v536_v9 = vsel (!%p390_p9), %vm531_vm1, %v1830_v7, 0  ;;  %v1831_v10 = vld [vmem:[%s2353_s3 + $0x8] ss:$0 sps:$4 sm:$0xff] (!%p390_p9)   ;;  %vm1937_vm2 = vmmov (!%p390_p9), 0   ;;  %v1833_v12 = vld [vmem:[%s2353_s3 + $0x18] sm:$0xff] (!%p390_p9)  }
  0x13   : > { %1668 = vmatpush3.bf16.xpose.msra.mxu1 (!%p390_p9), %v536_v9  ;;  %v539_v11 = vsel (!%p390_p9), %vm531_vm1, %v1831_v10, 0  ;;  %1671 = vmatprep.mubr.msk.bf16.mxu1 (!%p390_p9), %vm1937_vm2, %v1936_v8  ;;  %v650_v13 = vsel (!%p390_p9), %vm531_vm1, %v1833_v12, 0  ;;  %v1835_v14 = vld [vmem:[%s2353_s3 + $0x20] ss:$0 sps:$4 sm:$0xff] (!%p390_p9)   ;;  %s2370_s1 = sld [smem:[#allocation7_spill]] (!%p390_p9)  ;;  %s2371_s2 = sld [smem:[#allocation8_spill]] (!%p390_p9) }
  0x14   : > { %1669 = vmatprep.subr.bf16.mxu1 (!%p390_p9), %v1936_v8  ;;  %1687 = vmatprep.mubr.msk.bf16.mxu0 (!%p390_p9), %vm1937_vm2, %v1936_v8  ;;  %v653_v15 = vsel (!%p390_p9), %vm531_vm1, %v1835_v14, 0  ;;  %v1832_v24 = vld [vmem:[%s2353_s3 + $0xc] sm:$0xff] (!%p390_p9)   ;;  %s1938_s23 = smov (!%p390_p9), 104   ;;  %s1940_s30 = smov (!%p390_p9), 112   ;;  %v1834_v28 = vld [vmem:[%s2353_s3 + $0x14] ss:$0 sps:$4 sm:$0xff] (!%p390_p9)  }
  0x15   : > { %1684 = vmatpush3.bf16.xpose.msra.mxu0 (!%p390_p9), %v650_v13  ;;  %v593_v27 = vsel (!%p390_p9), %vm531_vm1, %v1832_v24, 0  ;;  %v596_v29 = vsel (!%p390_p9), %vm531_vm1, %v1834_v28, 0  ;;  %v1836_v30 = vld [vmem:[%s2353_s3 + $0x24] sm:$0xff] (!%p390_p9)   ;;  %v1837_v36 = vld [vmem:[%s2353_s3 + $0x2c] ss:$0 sps:$4 sm:$0xff] (!%p390_p9)   ;;  %vm1005_vm3 = vcmask (!%p390_p9), 1043456  }
  0x16   : > { %1685 = vmatprep.subr.bf16.mxu0 (!%p390_p9), %v1936_v8  ;;  %v707_v33 = vsel (!%p390_p9), %vm531_vm1, %v1836_v30, 0  ;;  %v710_v37 = vsel (!%p390_p9), %vm531_vm1, %v1837_v36, 0  ;;  %v1577_v40 = vld [vmem:[%s2354_s4] ss:$0 sm:$0xff] (!%p390_p9)  ;;  %v1578_v47 = vld [vmem:[%s2354_s4 + $0x1] ss:$0 sm:$0xff] (!%p390_p9) }
  0x17   : > { %v1579_v52 = vld [vmem:[%s2354_s4 + $0x2] ss:$0 sm:$0xff] (!%p390_p9)  ;;  %v1580_v63 = vld [vmem:[%s2354_s4 + $0x3] ss:$0 sm:$0xff] (!%p390_p9)  ;;  %s1943_s15 = smov (!%p390_p9), 24   ;;  %vm1198_vm4 = vcmask (!%p390_p9), 130112  }
  0x18   : > { %vm1204_vm5 = vcmask (!%p390_p9), 195712   ;;  %vm1210_vm6 = vcmask (!%p390_p9), 261312   ;;  %s1621_s16 = sshll.u32 (!%p390_p9), %s2036_s29, 7 }
  0x19   : > { %s433_s20 = scalar_select %p432_p10, %s2036_s29, 1  ;;  %v1575_v20 = vld [vmem:[%s2370_s1] ss:$0 sm:$0xff] }
  0x1a   : > { %v1576_v22 = vld [vmem:[%s2371_s2] ss:$0 sm:$0xff]  ;;  %s2307_s1 = scalar_lea.hbm %s2363_s13, %s1621_s16 }
  0x1b   : > { %s1574_s21 = sshll.u32 %s433_s20, 3  ;;  %1670 = vmatpush3.bf16.xpose.msra.mxu1 %v539_v11 }
  0x1c   : > { %s435_s24 = scalar_lea.vmem %s2369_s0, %s1574_s21  ;;  %1675 = vmatprep.subr.bf16.mxu1 %v1936_v8  ;;  %s429_s21 = sand.u32 1, %s1926_s26  }
  0x1d   : > { %v2068_v0 = vld [vmem:[%s435_s24] sm:$0xff]  ;;  %1686 = vmatpush3.bf16.xpose.msra.mxu0 %v653_v15  ;;  %s1939_s24 = smov 120   ;;  %s1573_s22 = sshll.u32 %s429_s21, 3 }
  0x1e   : > { %v441_v1 = vsel %vm440_vm0, %v2068_v0, 0.0  ;;  %1699 = vmatprep.subr.bf16.mxu0 %v1936_v8  ;;  %s1497_s29 = scalar_lea.sflag [#allocation4], %s429_s21 }
  0x1f   : > { %442 = vadd.xlane.f32.xlu0 %v441_v1 }
  0xac   : > { %v443_v2 = vpop.xlane.xlu0 %442 }
  0xad   : > { %v445_v3 = vmul.f32 0.03125, %v443_v2 }
  0xaf   : > { %v446_v4 = vsub.f32 %v2068_v0, %v445_v3 }
  0xb1   : > { %v447_v5 = vmul.f32 %v446_v4, %v446_v4 }
  0xb3   : > { %v448_v6 = vsel %vm440_vm0, %v447_v5, 0.0 }
  0xb4   : > { %449 = vadd.xlane.f32.xlu0 %v448_v6 }
 0x141   : > { %v450_v16 = vpop.xlane.xlu0 %449 }
 0x142   : > { %v451_v17 = vmul.f32 0.03125, %v450_v16 }
 0x144   : > { %v452_v18 = vadd.f32 1e-05, %v451_v17 }
 0x146   : > { %1850 = vrsqrt.f32 %v452_v18 }
 0x150   : > { %v1851_v19 = vpop.eup %1850 }
 0x151   : > { %v454_v21 = vmul.f32 %v1851_v19, %v446_v4 }
 0x153   : > { %v461_v23 = vmul.f32 %v1575_v20, %v454_v21 }
 0x155   : > { %v468_v25 = vadd.f32 %v1576_v22, %v461_v23 }
 0x157   : > { %476 = vrot.lane.b32.xlu0 %v468_v25, %s1938_s23  ;;  %470 = vrot.lane.b32.xlu1 %v468_v25, %s1939_s24  ;;  %v479_v26 = vpack.c.bf16 %v468_v25, %v468_v25  ;;  %s1942_s23 = smov 8  }
 0x159   : > { %1672 = vmatmul.mubr.msk.bf16.vlgmr.msra.gmra.mrb[0].mxu1 %vm531_vm1, %v479_v26 }
 0x15a   : > { %1676 = vmatpush3.bf16.xpose.msra.mxu1 %v593_v27  ;;  %1679 = vmatprep.mubr.msk.bf16.mxu1 %vm1937_vm2, %v1936_v8 }
 0x15b   : > { %473 = vrot.lane.b32.xlu1 %v468_v25, %s1940_s30  ;;  %1677 = vmatprep.subr.bf16.mxu1 %v1936_v8 }
 0x162   : > { %1678 = vmatpush3.bf16.xpose.msra.mxu1 %v596_v29 }
 0x163   : > { %1691 = vmatprep.subr.bf16.mxu1 %v1936_v8 }
 0x1c9   : > { %v471_v31 = vpop.permute.xlu1 %470  ;;  %v477_v38 = vpop.permute.xlu0 %476 }
 0x1ca   : > { %v480_v32 = vpack.c.bf16 %v471_v31, %v471_v31  ;;  %v482_v39 = vpack.c.bf16 %v477_v38, %v477_v38 }
 0x1cc   : > { %1680 = vmatmul.mubr.msk.bf16.vlgmr.msra.gmra.mrb[4].mxu1 %vm531_vm1, %v480_v32 }
 0x1cd   : > { %1692 = vmatpush3.bf16.xpose.msra.mxu1 %v707_v33  ;;  %v474_v34 = vpop.permute.xlu1 %473  ;;  %1695 = vmatprep.mubr.msk.bf16.mxu1 %vm1937_vm2, %v1936_v8 }
 0x1ce   : > { %v481_v35 = vpack.c.bf16 %v474_v34, %v474_v34  ;;  %1693 = vmatprep.subr.bf16.mxu1 %v1936_v8 }
 0x1d0   : > { %1688 = vmatmul.mubr.msk.bf16.vlgmr.msra.gmra.mrb[0].mxu0 %vm531_vm1, %v481_v35 }
 0x1d1   : > { %1701 = vmatprep.mubr.msk.bf16.mxu0 %vm1937_vm2, %v1936_v8 }
 0x1d5   : > { %1694 = vmatpush3.bf16.xpose.msra.mxu1 %v710_v37 }
 0x1d6   : > { %1705 = vmatprep.subr.bf16.mxu1 %v1936_v8 }
 0x1dc   : > { %1696 = vmatmul.mubr.msk.bf16.vlgmr.msra.gmra.mrb[8].mxu1 %vm531_vm1, %v482_v39 }
 0x1dd   : > { %1707 = vmatprep.mubr.msk.bf16.mxu1 %vm1937_vm2, %v1936_v8 }
 0x22c   : > { %v575_v41 = vpop.f32.mrb[0].mxu1 }
 0x22d   : > { %v576_v42 = vadd.f32 %v1577_v40, %v575_v41  ;;  %v1673_v43 = vpop.f32.mrb[1].mxu1 }
 0x22e   : > { %v578_v44 = vpop.f32.mrb[2].mxu1 }
 0x22f   : > { %v2143_v45 = vpack.c.bf16 %v576_v42, %v576_v42  ;;  %v1674_v46 = vpop.f32.mrb[3].mxu1 }
 0x231   : > { %757 = vrot.lane.b32.xlu1 %v2143_v45, %s1939_s24 }
 0x29f   : > { %v632_v48 = vpop.f32.mrb[4].mxu1 }
 0x2a0   : > { %v633_v49 = vadd.f32 %v1578_v47, %v632_v48  ;;  %v1681_v50 = vpop.f32.mrb[5].mxu1 }
 0x2a1   : > { %v635_v51 = vpop.f32.mrb[6].mxu1 }
 0x2a2   : > { %v2153_v53 = vpack.c.bf16 %v633_v49, %v633_v49  ;;  %v1682_v54 = vpop.f32.mrb[7].mxu1 }
 0x2a3   : > { %v689_v55 = vpop.f32.mrb[0].mxu0  ;;  %v758_v56 = vpop.permute.xlu1 %757 }
 0x2a4   : > { %v690_v57 = vadd.f32 %v1579_v52, %v689_v55  ;;  %v763_v58 = vsel %vm531_vm1, %v758_v56, 0  ;;  %v1689_v59 = vpop.f32.mrb[1].mxu0  ;;  %806 = vrot.lane.b32.xlu1 %v2153_v53, %s1939_s24 }
 0x2a5   : > { %v692_v60 = vpop.f32.mrb[2].mxu0  ;;  %1700 = vmatpush3.bf16.xpose.msra.mxu0 %v763_v58 }
 0x2a6   : > { %v2158_v61 = vpack.c.bf16 %v690_v57, %v690_v57  ;;  %v1690_v62 = vpop.f32.mrb[3].mxu0  ;;  %1711 = vmatprep.subr.bf16.mxu0 %v1936_v8 }
 0x2a8   : > { %855 = vrot.lane.b32.xlu1 %v2158_v61, %s1939_s24 }
 0x2ac   : > { %1702 = vmatmul.mubr.msk.bf16.vlgmr.msra.gmra.mrb[4].mxu0 %vm531_vm1, %v2143_v45 }
 0x2ad   : > { %1713 = vmatprep.mubr.msk.bf16.mxu0 %vm1937_vm2, %v1936_v8 }
 0x2af   : > { %v746_v1 = vpop.f32.mrb[8].mxu1 }
 0x2b0   : > { %v747_v2 = vadd.f32 %v1580_v63, %v746_v1  ;;  %v1697_v3 = vpop.f32.mrb[9].mxu1 }
 0x2b1   : > { %v749_v4 = vpop.f32.mrb[10].mxu1 }
 0x2b2   : > { %v2170_v5 = vpack.c.bf16 %v747_v2, %v747_v2  ;;  %v1698_v6 = vpop.f32.mrb[11].mxu1 }
 0x2b4   : > { %904 = vrot.lane.b32.xlu1 %v2170_v5, %s1939_s24  ;;  %s1941_s24 = smov 16  }
 0x316   : > { %v807_v7 = vpop.permute.xlu1 %806 }
 0x317   : > { %v812_v9 = vsel %vm531_vm1, %v807_v7, 0 }
 0x318   : > { %1706 = vmatpush3.bf16.xpose.msra.mxu1 %v812_v9 }
 0x319   : > { %1717 = vmatprep.subr.bf16.mxu1 %v1936_v8 }
 0x31a   : > { %v856_v10 = vpop.permute.xlu1 %855 }
 0x31b   : > { %v861_v11 = vsel %vm531_vm1, %v856_v10, 0 }
 0x31c   : > { %1712 = vmatpush3.bf16.xpose.msra.mxu0 %v861_v11 }
 0x31d   : > { %1723 = vmatprep.subr.bf16.mxu0 %v1936_v8 }
 0x31f   : > { %1708 = vmatmul.mubr.msk.bf16.vlgmr.msra.gmra.mrb[12].mxu1 %vm531_vm1, %v2153_v53 }
 0x320   : > { %1719 = vmatprep.mubr.msk.bf16.mxu1 %vm1937_vm2, %v1936_v8 }
 0x323   : > { %1714 = vmatmul.mubr.msk.bf16.vlgmr.msra.gmra.mrb[8].mxu0 %vm531_vm1, %v2158_v61 }
 0x324   : > { %1725 = vmatprep.mubr.msk.bf16.mxu0 %vm1937_vm2, %v1936_v8 }
 0x326   : > { %v905_v12 = vpop.permute.xlu1 %904 }
 0x327   : > { %v910_v13 = vsel %vm531_vm1, %v905_v12, 0 }
 0x328   : > { %1718 = vmatpush3.bf16.xpose.msra.mxu1 %v910_v13 }
 0x329   : > { %1729 = vmatprep.subr.bf16.mxu1 %v1936_v8 }
 0x32f   : > { %1720 = vmatmul.mubr.msk.bf16.vlgmr.msra.gmra.mrb[16].mxu1 %vm531_vm1, %v2170_v5 }
 0x330   : > { %1731 = vmatprep.mubr.msk.bf16.mxu1 %vm1937_vm2, %v1936_v8 }
 0x37f   : > { %v799_v14 = vpop.f32.mrb[4].mxu0 }
 0x380   : > { %v1703_v15 = vpop.f32.mrb[5].mxu0  ;;  %v952_v16 = vsel %vm531_vm1, %v799_v14, -inf }
 0x381   : > { %v802_v17 = vpop.f32.mrb[6].mxu0  ;;  %953 = vmax.xlane.f32.xlu1 %v952_v16 }
 0x382   : > { %v1704_v18 = vpop.f32.mrb[7].mxu0 }
 0x3f2   : > { %v848_v19 = vpop.f32.mrb[12].mxu1 }
 0x3f3   : > { %v1709_v20 = vpop.f32.mrb[13].mxu1  ;;  %v955_v21 = vsel %vm531_vm1, %v848_v19, -inf }
 0x3f4   : > { %956 = vmax.xlane.f32.xlu0 %v955_v21  ;;  %v851_v22 = vpop.f32.mrb[14].mxu1 }
 0x3f5   : > { %v1710_v23 = vpop.f32.mrb[15].mxu1  ;;  %v1838_v22 = vld [vmem:[%s2355_s5] sm:$0xff]  }
 0x3f6   : > { %v897_v24 = vpop.f32.mrb[8].mxu0 }
 0x3f7   : > { %v1715_v25 = vpop.f32.mrb[9].mxu0  ;;  %v958_v26 = vsel %vm531_vm1, %v897_v24, -inf }
 0x3f8   : > { %v900_v27 = vpop.f32.mrb[10].mxu0  ;;  %959 = vmax.xlane.f32.xlu1 %v958_v26  ;;  %v1839_v25 = vld [vmem:[%s2355_s5 + $0x8] sm:$0xff]  }
 0x3f9   : > { %v1716_v28 = vpop.f32.mrb[11].mxu0 }
 0x402   : > { %v946_v29 = vpop.f32.mrb[16].mxu1 }
 0x403   : > { %v1721_v30 = vpop.f32.mrb[17].mxu1  ;;  %v961_v31 = vsel %vm531_vm1, %v946_v29, -inf }
 0x404   : > { %962 = vmax.xlane.f32.xlu0 %v961_v31  ;;  %v949_v32 = vpop.f32.mrb[18].mxu1 }
 0x405   : > { %v1722_v33 = vpop.f32.mrb[19].mxu1 }
 0x409   : > { %1000 = vrot.lane.b32.xlu1 %v2143_v45, %s1940_s30 }
 0x40e   : > { %v954_v34 = vpop.xlane.xlu1 %953 }
 0x40f   : > { %v964_v35 = vsub.f32 %v799_v14, %v954_v34 }
 0x411   : > { %v968_v36 = vmul.f32 1.442695, %v964_v35 }
 0x413   : > { %1852 = vpow2.f32 %v968_v36 }
 0x41d   : > { %v1853_v37 = vpop.eup %1852 }
 0x41e   : > { %v976_v38 = vsel %vm531_vm1, %v1853_v37, 0.0 }
 0x42d   : > { %977 = vadd.xlane.f32.xlu1 %v976_v38 }
 0x481   : > { %v957_v39 = vpop.xlane.xlu0 %956 }
 0x482   : > { %v965_v40 = vsub.f32 %v848_v19, %v957_v39  ;;  %v1601_v39 = vld [vmem:[%s2356_s6] ss:$0 sm:$0xff] }
 0x484   : > { %v970_v41 = vmul.f32 1.442695, %v965_v40 }
 0x485   : > { %v960_v42 = vpop.xlane.xlu1 %959 }
 0x486   : > { %1854 = vpow2.f32 %v970_v41  ;;  %v966_v43 = vsub.f32 %v897_v24, %v960_v42 }
 0x488   : > { %v972_v44 = vmul.f32 1.442695, %v966_v43 }
 0x489   : > { %v1001_v46 = vpop.permute.xlu1 %1000 }
 0x48a   : > { %1856 = vpow2.f32 %v972_v44  ;;  %v1007_v45 = vsel %vm1005_vm3, %v1001_v46, 0 }
 0x48b   : > { %1724 = vmatpush3.bf16.msra.mxu0 %v1007_v45 }
 0x48c   : > { %1735 = vmatprep.subr.bf16.mxu0 %v1936_v8 }
 0x490   : > { %v1855_v47 = vpop.eup %1854 }
 0x491   : > { %v963_v48 = vpop.xlane.xlu0 %962  ;;  %v979_v49 = vsel %vm531_vm1, %v1855_v47, 0.0 }
 0x492   : > { %v967_v50 = vsub.f32 %v946_v29, %v963_v48  ;;  %980 = vadd.xlane.f32.xlu0 %v979_v49 }
 0x494   : > { %v1857_v51 = vpop.eup %1856  ;;  %v974_v52 = vmul.f32 1.442695, %v967_v50 }
 0x495   : > { %v982_v54 = vsel %vm531_vm1, %v1857_v51, 0.0 }
 0x496   : > { %1858 = vpow2.f32 %v974_v52  ;;  %983 = vadd.xlane.f32.xlu1 %v982_v54  ;;  %v1840_v52 = vld [vmem:[%s2359_s9] sm:$0xff]  }
 0x497   : > { %v1842_v54 = vld [vmem:[%s2361_s11] sm:$0xff]  }
 0x4a0   : > { %v1859_v55 = vpop.eup %1858 }
 0x4a1   : > { %v985_v56 = vsel %vm531_vm1, %v1859_v55, 0.0 }
 0x4a2   : > { %986 = vadd.xlane.f32.xlu0 %v985_v56  ;;  %v1844_v56 = vld [vmem:[%s2361_s11 + $0x10] sm:$0xff]  }
 0x4a7   : > { %1097 = vrot.lane.b32.xlu1 %v2158_v61, %s1940_s30 }
 0x4ab   : > { %1145 = vrot.lane.b32.xlu1 %v2170_v5, %s1940_s30 }
 0x4b8   : > { %1049 = vrot.lane.b32.xlu0 %v2153_v53, %s1940_s30 }
 0x4ba   : > { %v978_v57 = vpop.xlane.xlu1 %977 }
 0x4bb   : > { %1860 = vrcp.f32 %v978_v57 }
 0x4c5   : > { %v1861_v58 = vpop.eup %1860 }
 0x4c6   : > { %v992_v59 = vmul.f32 %v1861_v58, %v1853_v37 }
 0x4c8   : > { %v996_v60 = vpack.c.bf16 %v992_v59, %v992_v59 }
 0x4ca   : > { %1726 = vmatmul.mubr.msk.bf16.vlgmr.msra.gmra.mrb[12].mxu0 %vm531_vm1, %v996_v60 }
 0x4cb   : > { %1737 = vmatprep.mubr.msk.bf16.mxu0 %vm1937_vm2, %v1936_v8 }
 0x51f   : > { %v981_v62 = vpop.xlane.xlu0 %980 }
 0x523   : > { %v984_v63 = vpop.xlane.xlu1 %983 }
 0x524   : > { %1862 = vrcp.f32 %v984_v63 }
 0x525   : > { %1864 = vrcp.f32 %v981_v62  ;;  %v1605_v62 = vld [vmem:[%s2357_s7] ss:$0 sm:$0xff] }
 0x527   : > { %v1098_v61 = vpop.permute.xlu1 %1097 }
 0x528   : > { %v1103_v1 = vsel %vm1005_vm3, %v1098_v61, 0  ;;  %v1606_v61 = vld [vmem:[%s2358_s8] ss:$0 sm:$0xff] }
 0x529   : > { %1736 = vmatpush3.bf16.msra.mxu0 %v1103_v1 }
 0x52a   : > { %1747 = vmatprep.subr.bf16.mxu0 %v1936_v8 }
 0x52b   : > { %v1146_v10 = vpop.permute.xlu1 %1145 }
 0x52c   : > { %v1151_v12 = vsel %vm1005_vm3, %v1146_v10, 0 }
 0x52e   : > { %v1863_v53 = vpop.eup %1862 }
 0x52f   : > { %v1865_v2 = vpop.eup %1864  ;;  %v994_v3 = vmul.f32 %v1863_v53, %v1857_v51  ;;  %v987_v4 = vpop.xlane.xlu0 %986 }
 0x530   : > { %1866 = vrcp.f32 %v987_v4  ;;  %v993_v6 = vmul.f32 %v1865_v2, %v1855_v47  ;;  %v1846_v4 = vld [vmem:[%s2361_s11 + $0x20] sm:$0xff]  }
 0x531   : > { %v998_v5 = vpack.c.bf16 %v994_v3, %v994_v3  ;;  %v1845_v3 = vld [vmem:[%s2361_s11 + $0x18] sm:$0xff]  }
 0x532   : > { %v997_v11 = vpack.c.bf16 %v993_v6, %v993_v6  ;;  %v1848_v6 = vld [vmem:[%s2361_s11 + $0x30] sm:$0xff]  }
 0x533   : > { %v1050_v7 = vpop.permute.xlu0 %1049  ;;  %1738 = vmatmul.mubr.msk.bf16.vlgmr.msra.gmra.mrb[16].mxu0 %vm531_vm1, %v998_v5  ;;  %v1847_v5 = vld [vmem:[%s2361_s11 + $0x28] sm:$0xff]  }
 0x534   : > { %v1055_v9 = vsel %vm1005_vm3, %v1050_v7, 0  ;;  %1751 = vmatprep.mubr.msk.bf16.mxu0 %vm1937_vm2, %v1936_v8  ;;  %1748 = vmatpush3.bf16.msra.mxu0 %v1838_v22  ;;  %v1849_v7 = vld [vmem:[%s2361_s11 + $0x38] sm:$0xff]  }
 0x535   : > { %1730 = vmatpush3.bf16.msra.mxu1 %v1055_v9  ;;  %1749 = vmatprep.subr.bf16.mxu0 %v1936_v8  ;;  %v1607_v9 = vld [vmem:[%s2360_s10] ss:$0 sm:$0xff] }
 0x536   : > { %1741 = vmatprep.subr.bf16.mxu1 %v1936_v8 }
 0x538   : > { %1732 = vmatmul.mubr.msk.bf16.vlgmr.msra.gmra.mrb[20].mxu1 %vm531_vm1, %v997_v11  ;;  %1750 = vmatpush3.bf16.msra.mxu0 %v1839_v25 }
 0x539   : > { %1742 = vmatpush3.bf16.msra.mxu1 %v1151_v12  ;;  %1743 = vmatprep.mubr.msk.bf16.mxu1 %vm1937_vm2, %v1936_v8 }
 0x53a   : > { %v1867_v13 = vpop.eup %1866  ;;  %1755 = vmatprep.subr.bf16.mxu1 %v1936_v8  ;;  %1763 = vmatprep.subr.bf16.mxu0 %v1936_v8 }
 0x53b   : > { %v995_v14 = vmul.f32 %v1867_v13, %v1859_v55  ;;  %v1843_v55 = vld [vmem:[%s2361_s11 + $0x8] sm:$0xff]  }
 0x53d   : > { %v999_v15 = vpack.c.bf16 %v995_v14, %v995_v14 }
 0x540   : > { %1744 = vmatmul.mubr.msk.bf16.vlgmr.msra.gmra.mrb[24].mxu1 %vm531_vm1, %v999_v15 }
 0x541   : > { %1759 = vmatprep.mubr.msk.bf16.mxu1 %vm1937_vm2, %v1936_v8  ;;  %1756 = vmatpush3.bf16.msra.mxu1 %v1840_v52 }
 0x542   : > { %1757 = vmatprep.subr.bf16.mxu1 %v1936_v8 }
 0x59d   : > { %v1043_v16 = vpop.f32.mrb[12].mxu0 }
 0x59e   : > { %1193 = vst.msk [vmem:[#allocation2] sm:$0xff] %vm531_vm1, %v1043_v16  ;;  %v1727_v17 = vpop.f32.mrb[13].mxu0 }
 0x59f   : > { %v1046_v18 = vpop.f32.mrb[14].mxu0 }
 0x5a0   : > { %v1728_v19 = vpop.f32.mrb[15].mxu0 }
 0x606   : > { %v1139_v20 = vpop.f32.mrb[16].mxu0 }
 0x607   : > { %1201 = vrot.lane.b32.xlu1 %v1139_v20, %s1941_s24  ;;  %v1739_v21 = vpop.f32.mrb[17].mxu0  ;;  %v1611_v20 = vld [vmem:[%s2362_s12] ss:$0 sm:$0xff]  ;;  %s431_s24 = scalar_lea.vmem [#allocation3], %s1573_s22 }
 0x608   : > { %v1142_v23 = vpop.f32.mrb[18].mxu0  ;;  %s1510_s30 = sshll.u32 %s431_s24, 4  ;;  %s2309_s30 = int_to_ptr.vmem [resolvable:$true] %s1510_s30 }
 0x609   : > { %v1740_v24 = vpop.f32.mrb[19].mxu0  ;;  %s1872_s22 = scalar_lea.vmem %s2309_s30, 128 }
 0x60a   : > { %p1873_p11 = scmp.ne.s32.totalorder %s2309_s30, %s1872_s22 }
 0x60b   : > { %v1091_v26 = vpop.f32.mrb[20].mxu1 }
 0x60c   : > { %1195 = vrot.lane.b32.xlu0 %v1091_v26, %s1942_s23  ;;  %v1733_v27 = vpop.f32.mrb[21].mxu1  ;;  %p1874_p12 = pnand %p1873_p11, %p2053_p5  ;;  %s1944_s23 = smov [#allocation3]  }
 0x60d   : > { %v1094_v28 = vpop.f32.mrb[22].mxu1 }
 0x60e   : > { %v1734_v29 = vpop.f32.mrb[23].mxu1  ;;  %p1875_p13 = pneg %p1874_p12 }
 0x613   : > { %v1187_v30 = vpop.f32.mrb[24].mxu1 }
 0x614   : > { %1207 = vrot.lane.b32.xlu0 %v1187_v30, %s1943_s15  ;;  %v1745_v31 = vpop.f32.mrb[25].mxu1  ;;  %s1876_s15 = sshll.u32 %s1944_s23, 4  ;;  %s1877_s15 = int_to_ptr.vmem [resolvable:$false] %s1876_s15 }
 0x615   : > { %v1190_v32 = vpop.f32.mrb[26].mxu1  ;;  %s1878_s2 = scalar_lea.vmem %s1877_s15, 256  ;;  %p1879_p0 = scmp.lt.s32.totalorder %s2309_s30, %s1877_s15 }
 0x616   : > { %v1746_v33 = vpop.f32.mrb[27].mxu1  ;;  %p1880_p1 = scmp.lt.s32.totalorder %s1878_s2, %s1872_s22 }
 0x618   : > { %p1881_p2 = por %p1880_p1, %p1879_p0 }
 0x61a   : > { %p1882_p3 = pnand %p1881_p2, %p1875_p13 }
 0x679   : > { %v1202_v35 = vpop.permute.xlu1 %1201 }
 0x67e   : > { %v1196_v34 = vpop.permute.xlu0 %1195 }
 0x67f   : > { %1199 = vst.msk [vmem:[#allocation2] sm:$0xff] %vm1198_vm4, %v1196_v34 }
 0x680   : > { %1205 = vst.msk [vmem:[#allocation2] sm:$0xff] %vm1204_vm5, %v1202_v35 }
 0x686   : > { %v1208_v36 = vpop.permute.xlu0 %1207 }
 0x687   : > { %1211 = vst.msk [vmem:[#allocation2] sm:$0xff] %vm1210_vm6, %v1208_v36 }
 0x68e   : > { %v1212_v37 = vld [vmem:[#allocation2] sm:$0xff] }
 0x68f   : > { %v1213_v38 = vpack.c.bf16 %v1212_v37, %v1212_v37 }
 0x691   : > { %1752 = vmatmul.mubr.msk.bf16.vlgmr.msra.gmra.mrb[20].mxu0 %vm440_vm0, %v1213_v38 }
 0x692   : > { %1779 = vmatprep.mubr.msk.bf16.mxu0 %vm1937_vm2, %v1936_v8  ;;  %1764 = vmatpush3.bf16.msra.mxu0 %v1842_v54 }
 0x693   : > { %1765 = vmatprep.subr.bf16.mxu0 %v1936_v8 }
 0x696   : > { %1766 = vmatpush3.bf16.msra.mxu0 %v1843_v55 }
 0x697   : > { %1767 = vmatprep.subr.bf16.mxu0 %v1936_v8 }
 0x69a   : > { %1768 = vmatpush3.bf16.msra.mxu0 %v1844_v56 }
 0x69b   : > { %1769 = vmatprep.subr.bf16.mxu0 %v1936_v8 }
 0x69e   : > { %1770 = vmatpush3.bf16.msra.mxu0 %v1845_v3 }
 0x69f   : > { %1771 = vmatprep.subr.bf16.mxu0 %v1936_v8 }
 0x6a2   : > { %1772 = vmatpush3.bf16.msra.mxu0 %v1846_v4 }
 0x6a3   : > { %1773 = vmatprep.subr.bf16.mxu0 %v1936_v8 }
 0x6a6   : > { %1774 = vmatpush3.bf16.msra.mxu0 %v1847_v5 }
 0x6a7   : > { %1775 = vmatprep.subr.bf16.mxu0 %v1936_v8 }
 0x6aa   : > { %1776 = vmatpush3.bf16.msra.mxu0 %v1848_v6 }
 0x6ab   : > { %1777 = vmatprep.subr.bf16.mxu0 %v1936_v8 }
 0x6ae   : > { %1778 = vmatpush3.bf16.msra.mxu0 %v1849_v7 }
 0x764   : > { %v1274_v40 = vpop.f32.mrb[20].mxu0 }
 0x765   : > { %v1275_v41 = vadd.f32 %v1601_v39, %v1274_v40  ;;  %v1753_v42 = vpop.f32.mrb[21].mxu0 }
 0x766   : > { %v1277_v43 = vpop.f32.mrb[22].mxu0 }
 0x767   : > { %v2244_v44 = vadd.f32 %v1275_v41, %v2068_v0  ;;  %v1754_v46 = vpop.f32.mrb[23].mxu0  ;;  %v1841_v0 = vld [vmem:[%s2359_s9 + $0x8] sm:$0xff]  }
 0x768   : > { %1758 = vmatpush3.bf16.msra.mxu1 %v1841_v0 }
 0x769   : > { %v1283_v45 = vsel %vm440_vm0, %v2244_v44, 0.0 }
 0x76a   : > { %1284 = vadd.xlane.f32.xlu1 %v1283_v45 }
 0x7f7   : > { %v1285_v47 = vpop.xlane.xlu1 %1284 }
 0x7f8   : > { %v1286_v48 = vmul.f32 0.03125, %v1285_v47 }
 0x7fa   : > { %v1287_v49 = vsub.f32 %v2244_v44, %v1286_v48 }
 0x7fc   : > { %v1288_v50 = vmul.f32 %v1287_v49, %v1287_v49 }
 0x7fe   : > { %v1289_v51 = vsel %vm440_vm0, %v1288_v50, 0.0 }
 0x7ff   : > { %1290 = vadd.xlane.f32.xlu0 %v1289_v51 }
 0x88c   : > { %v1291_v57 = vpop.xlane.xlu0 %1290 }
 0x88d   : > { %v1292_v58 = vmul.f32 0.03125, %v1291_v57 }
 0x88f   : > { %v1293_v59 = vadd.f32 1e-05, %v1292_v58 }
 0x891   : > { %1868 = vrsqrt.f32 %v1293_v59 }
 0x89b   : > { %v1869_v60 = vpop.eup %1868 }
 0x89c   : > { %v1295_v63 = vmul.f32 %v1869_v60, %v1287_v49 }
 0x89e   : > { %v1302_v1 = vmul.f32 %v1605_v62, %v1295_v63 }
 0x8a0   : > { %v1309_v53 = vadd.f32 %v1606_v61, %v1302_v1 }
 0x8a2   : > { %v1310_v2 = vpack.c.bf16 %v1309_v53, %v1309_v53 }
 0x8a4   : > { %1760 = vmatmul.mubr.msk.bf16.vlgmr.msra.gmra.mrb[28].mxu1 %vm440_vm0, %v1310_v2 }
 0x977   : > { %v1371_v10 = vpop.f32.mrb[28].mxu1 }
 0x978   : > { %v1372_v11 = vadd.f32 %v1607_v9, %v1371_v10  ;;  %v1761_v12 = vpop.f32.mrb[29].mxu1 }
 0x979   : > { %v1374_v13 = vpop.f32.mrb[30].mxu1 }
 0x97a   : > { %v1378_v14 = vmul.f32 0.70710677, %v1372_v11  ;;  %v1762_v15 = vpop.f32.mrb[31].mxu1  ;;  %v1377_v8 = vmul.f32 0.5, %v1372_v11 }
 0x97c   : > { %1870 = verf.f32 %v1378_v14 }
 0x986   : > { %v1871_v16 = vpop.eup %1870 }
 0x987   : > { %v1380_v17 = vadd.f32 1.0, %v1871_v16 }
 0x989   : > { %v1381_v18 = vmul.f32 %v1380_v17, %v1377_v8 }
 0x98b   : > { %v1382_v19 = vpack.c.bf16 %v1381_v18, %v1381_v18 }
 0x98d   : > { %1780 = vmatmul.mubr.bf16.vlgmr.msra.gmra.mrb[24].mxu0 %v1382_v19 }
 0xa60   : > { %v1488_v21 = vpop.f32.mrb[24].mxu0 }
 0xa61   : > { %v1489_v22 = vadd.f32 %v1611_v20, %v1488_v21  ;;  %v1781_v23 = vpop.f32.mrb[25].mxu0 }
 0xa62   : > { %v1491_v24 = vpop.f32.mrb[26].mxu0 }
 0xa63   : > { %v1494_v25 = vadd.f32 %v1489_v22, %v2244_v44  ;;  %v1782_v26 = vpop.f32.mrb[27].mxu0 }
 0xa65   : > { %1495 = vst.msk [vmem:[%s431_s24] sm:$0xff] %vm440_vm0, %v1494_v25 }
 0xa66   : > { %1885 = shalt.err (!%p1882_p3)
}
 0xa67   : > { %s1886_s0 = scalar_lea.hbm %s2307_s1, 128  ;;  %s1890_s24 = scalar_lea.hbm %s2363_s13, 256 }
 0xa68   : > { %p1887_p4 = scmp.ne.s32.totalorder %s2307_s1, %s1886_s0  ;;  %p1891_p9 = scmp.lt.u32.totalorder %s2307_s1, %s2363_s13 }
 0xa69   : > { %p1892_p10 = scmp.lt.u32.totalorder %s1890_s24, %s1886_s0  ;;  %p1894_p12 = scmp.lt.u32.totalorder %s1886_s0, %s2307_s1 }
 0xa6a   : > { %p1888_p7 = pnand %p1887_p4, %p2053_p5 }
 0xa6b   : > { %p1893_p11 = por %p1892_p10, %p1891_p9 }
 0xa6c   : > { %p1889_p8 = pneg %p1888_p7 }
 0xa6d   : > { %p1895_p13 = por %p1894_p12, %p1893_p11 }
 0xa6f   : > { %p1896_p0 = pnand %p1895_p13, %p1889_p8 }
 0xa71   : > { %1899 = shalt.err (!%p1896_p0)
}
 0xa72   : > { %1783 = dma.vmem_to_hbm [thread:$0]  (%p2053_p5), %s2309_s30, 128, %s2307_s1, %s1497_s29  }
 0xa73 PF: > { %p1789_p1 = scmp.ge.s32.totalorder %s1934_s28, 2  ;;  %s1522_s2 = sand.u32 1, %s1922_s25  }
 0xa74   : > { %s1523_s22 = scalar_lea.sflag [#allocation4], %s1522_s2 }
 0xa75   : > { %p1786_p2 = pnand %p1789_p1, %p2057_p6 }
 0xa77   : > { %1917 = dma.done.wait (!%p1786_p2), %s1523_s22, 128  }
 0xa78   : > { %1919 = vsyncadd (!%p1786_p2), %s1523_s22, 4294967168  ;;  %p23_p3 = scmp.ge.s32.totalorder %s2040_s14, 4   ;;  %s2372_s25 = smov %s1926_s26 }
 0xa79   : > { %s2373_s26 = smov %s1930_s27  ;;  %s2374_s27 = smov %s2051_s17 }
 0xa7a   : > { %s2375_s28 = smov %s2040_s14  ;;  %25 = sbr.rel (!%p23_p3) target bundleno = 7 (0x7), region = 107 }
 0xa81   :  { %1528 = vsyncpa [#allocation4], 1 }
 0xa82   :  { %1530 = vsyncpa [#allocation4 + $0x1], 1 }

</bundles_post_ra>
